<compile_context>
chip_gen: v7x
topology: tpu7x:2x2x1
jax: 0.10.0
libtpu: 0.0.40
codegen_flags: <defaults>
</compile_context>

<pallas_src>
import functools

import jax
import jax.numpy as jnp
from jax import lax
from jax.experimental import pallas as pl
from jax.experimental.pallas import tpu as pltpu

EPS = 1e-5
_VMEM_LIMIT = 32 * 1024 * 1024   # scoped-VMEM ceiling safe on v5e/v6e/v7x


def _round_up(x, m):
    return (x + m - 1) // m * m


# ---------------------------------------------------------------------------
# Small-N fast path: one launch, everything VMEM-resident.
# ---------------------------------------------------------------------------
def _fused_kernel(x_ref, w0_ref, b0_ref, g0_ref, be0_ref,
                  w1_ref, b1_ref, g1_ref, be1_ref,
                  w2t_ref, b2t_ref, out_ref, *, n_rows):
    n_pad = x_ref.shape[0]
    inv_n = 1.0 / n_rows
    valid = lax.broadcasted_iota(jnp.int32, (n_pad, 1), 0) < n_rows

    def bn_train(h, gamma, beta):
        # training-mode BatchNorm1d (biased variance), two-pass like torch
        hm = jnp.where(valid, h, 0.0)
        mu = jnp.sum(hm, axis=0, keepdims=True) * inv_n
        d = jnp.where(valid, h - mu, 0.0)
        var = jnp.sum(d * d, axis=0, keepdims=True) * inv_n
        return gamma * (h - mu) * lax.rsqrt(var + EPS) + beta

    h = jnp.dot(x_ref[...], w0_ref[...], preferred_element_type=jnp.float32)
    h = jnp.maximum(h + b0_ref[...], 0.0)
    h = bn_train(h, g0_ref[...], be0_ref[...])

    h = jnp.dot(h, w1_ref[...], preferred_element_type=jnp.float32)
    h = jnp.maximum(h + b1_ref[...], 0.0)
    h = bn_train(h, g1_ref[...], be1_ref[...])

    # Lane-dense output: contract the hidden axis of h against w2^T so the
    # result is (out_dim, n_pad) -- rows along lanes, unmasked stores.
    z = lax.dot_general(w2t_ref[...], h, (((1,), (1,)), ((), ())),
                        preferred_element_type=jnp.float32) + b2t_ref[...]
    out_ref[...] = 1.0 / (1.0 + jnp.exp(-z))   # exact sigmoid


# ---------------------------------------------------------------------------
# Large-N streamed path.
# Pass 1/2: h = relu(x @ W + b); cache h; accumulate per-feature sum / sumsq.
# ---------------------------------------------------------------------------
def _layer_stats_kernel(x_ref, w_ref, b_ref, h_ref, sum_ref, sumsq_ref,
                        *, n_rows, tile):
    i = pl.program_id(0)

    @pl.when(i == 0)
    def _():
        sum_ref[...] = jnp.zeros_like(sum_ref)
        sumsq_ref[...] = jnp.zeros_like(sumsq_ref)

    h = jnp.dot(x_ref[...], w_ref[...], preferred_element_type=jnp.float32)
    h = jnp.maximum(h + b_ref[...], 0.0)
    h_ref[...] = h

    # mask rows that are only padding (beyond the true batch size)
    row = i * tile + lax.broadcasted_iota(jnp.int32, (tile, 1), 0)
    hm = jnp.where(row < n_rows, h, 0.0)
    sum_ref[...] += jnp.sum(hm, axis=0, keepdims=True)
    # TODO(synk): var = E[h^2] - mu^2 can lose precision for very large N with
    # large post-ReLU means; switch to shifted/compensated sums in that regime.
    sumsq_ref[...] += jnp.sum(hm * hm, axis=0, keepdims=True)


# Pass 3: sigmoid of the folded output projection, stored lane-dense.
def _output_kernel(h_ref, w2t_ref, b2t_ref, out_ref):
    z = lax.dot_general(w2t_ref[...], h_ref[...], (((1,), (1,)), ((), ())),
                        preferred_element_type=jnp.float32) + b2t_ref[...]
    out_ref[...] = 1.0 / (1.0 + jnp.exp(-z))


def _fold_bn(s, ss, n, gamma, beta):
    """scale/shift so that bn(h) == h * scale + shift (training-mode stats)."""
    mu = s / n
    var = jnp.maximum(ss / n - mu * mu, 0.0)   # biased variance
    scale = gamma * lax.rsqrt(var + EPS)
    shift = beta - mu * scale
    return scale, shift


def edgenet_forward(v1, v2, params, *, block_rows=4096, small_rows_max=4096,
                    force_multipass=False):
    """EdgeNet forward. params = (w0,b0,g0,be0,w1,b1,g1,be1,w2,b2), W as (in,out)."""
    (w0, b0, g0, be0, w1, b1, g1, be1, w2, b2) = params
    n, node_dim = v1.shape
    hid0 = w0.shape[1]
    hid1 = w1.shape[1]
    out_dim = w2.shape[1]

    # Single concatenated (N, 2*node_dim) operand (one-time XLA layout op).
    x = jnp.concatenate([v1, v2], axis=1)

    cp_reduce = pltpu.CompilerParams(
        dimension_semantics=("arbitrary",), vmem_limit_bytes=_VMEM_LIMIT)
    cp_parallel = pltpu.CompilerParams(
        dimension_semantics=("parallel",), vmem_limit_bytes=_VMEM_LIMIT)

    # ------------------ small-N fast path: single fused launch ---------------
    if (not force_multipass) and n <= small_rows_max:
        n_pad = _round_up(n, 8)
        if n_pad != n:
            x = jnp.pad(x, ((0, n_pad - n), (0, 0)))

        def full(arr):
            nd = arr.ndim
            return pl.BlockSpec(arr.shape, lambda i: (0,) * nd)

        w2t = w2.T          # (out_dim, hid1)
        b2t = b2.T          # (out_dim, 1)
        args = (x, w0, b0, g0, be0, w1, b1, g1, be1, w2t, b2t)

        out_t = pl.pallas_call(
            functools.partial(_fused_kernel, n_rows=n),
            grid=(1,),
            in_specs=[full(a) for a in args],
            out_specs=pl.BlockSpec((out_dim, n_pad), lambda i: (0, 0)),
            out_shape=jax.ShapeDtypeStruct((out_dim, n_pad), jnp.float32),
            compiler_params=cp_reduce,
        )(*args)
        return out_t.T[:n]

    # ------------------ large-N streamed path --------------------------------
    tile = _round_up(min(block_rows, _round_up(n, 128)), 128)
    n_pad = _round_up(n, tile)
    grid = (n_pad // tile,)
    if n_pad != n:
        x = jnp.pad(x, ((0, n_pad - n), (0, 0)))

    def rep(arr):        # grid-invariant (VMEM-resident) small operand
        return pl.BlockSpec(arr.shape, lambda i: (0, 0))

    def rows(width):     # streamed row tile
        return pl.BlockSpec((tile, width), lambda i: (i, 0))

    def stat_spec(width):
        return pl.BlockSpec((1, width), lambda i: (0, 0))

    def stat_shape(width):
        return jax.ShapeDtypeStruct((1, width), jnp.float32)

    # pass 1: h0 = relu(x@W0 + b0); cache h0; accumulate its BN stats
    h0, sum0, sumsq0 = pl.pallas_call(
        functools.partial(_layer_stats_kernel, n_rows=n, tile=tile),
        grid=grid,
        in_specs=[rows(2 * node_dim), rep(w0), rep(b0)],
        out_specs=(rows(hid0), stat_spec(hid0), stat_spec(hid0)),
        out_shape=(jax.ShapeDtypeStruct((n_pad, hid0), jnp.float32),
                   stat_shape(hid0), stat_shape(hid0)),
        compiler_params=cp_reduce,
    )(x, w0, b0)

    # fold BN0 into layer 1: W1' = sc0 * W1, b1' = sh0 @ W1 + b1
    sc0, sh0 = _fold_bn(sum0, sumsq0, n, g0, be0)
    w1f = sc0.T * w1
    b1f = sh0 @ w1 + b1

    # pass 2: h1 = relu(bn0(h0)@W1 + b1) via folded weights; cache h1 + stats
    h1, sum1, sumsq1 = pl.pallas_call(
        functools.partial(_layer_stats_kernel, n_rows=n, tile=tile),
        grid=grid,
        in_specs=[rows(hid0), rep(w1f), rep(b1f)],
        out_specs=(rows(hid1), stat_spec(hid1), stat_spec(hid1)),
        out_shape=(jax.ShapeDtypeStruct((n_pad, hid1), jnp.float32),
                   stat_shape(hid1), stat_shape(hid1)),
        compiler_params=cp_reduce,
    )(h0, w1f, b1f)

    # fold BN1 into the output projection; pre-transpose for lane-dense stores
    sc1, sh1 = _fold_bn(sum1, sumsq1, n, g1, be1)
    w2tf = (sc1.T * w2).T          # (out_dim, hid1)
    b2tf = (sh1 @ w2 + b2).T       # (out_dim, 1)

    # pass 3: sigmoid(bn1(h1)@W2 + b2), stored transposed (out_dim, n_pad)
    out_t = pl.pallas_call(
        _output_kernel,
        grid=grid,
        in_specs=[rows(hid1), rep(w2tf), rep(b2tf)],
        out_specs=pl.BlockSpec((out_dim, tile), lambda i: (0, i)),
        out_shape=jax.ShapeDtypeStruct((out_dim, n_pad), jnp.float32),
        compiler_params=cp_parallel,
    )(h1, w2tf, b2tf)

    return out_t.T[:n]


def init_params(key, node_dim, hidden_dim, num_layers, out_dim):
    """Deterministic PyTorch-style init: U(-1/sqrt(fan_in), 1/sqrt(fan_in))."""
    dims = [2 * node_dim] + [hidden_dim] * (num_layers - 1) + [out_dim]
    params = []
    for i in range(num_layers):
        fan_in, fan_out = dims[i], dims[i + 1]
        key, kw, kb = jax.random.split(key, 3)
        bound = 1.0 / jnp.sqrt(jnp.float32(fan_in))
        # stored transposed: (in, out) so the kernel does x @ W
        w = jax.random.uniform(kw, (fan_in, fan_out), jnp.float32, -bound, bound)
        b = jax.random.uniform(kb, (1, fan_out), jnp.float32, -bound, bound)
        params.append(w)
        params.append(b)
        if i < num_layers - 1:
            params.append(jnp.ones((1, fan_out), jnp.float32))   # BN gamma
            params.append(jnp.zeros((1, fan_out), jnp.float32))  # BN beta
    return tuple(params)


def reference_forward(v1, v2, params):
    """Pure-JAX reference with the module's training-mode BN semantics."""
    (w0, b0, g0, be0, w1, b1, g1, be1, w2, b2) = params
    x = jnp.concatenate([v1, v2], axis=1)

    def block(h, w, b, g, be):
        h = jnp.maximum(h @ w + b, 0.0)
        mu = jnp.mean(h, axis=0, keepdims=True)
        var = jnp.mean((h - mu) ** 2, axis=0, keepdims=True)
        return g * (h - mu) / jnp.sqrt(var + EPS) + be

    h = block(x, w0, b0, g0, be0)
    h = block(h, w1, b1, g1, be1)
    return jax.nn.sigmoid(h @ w2 + b2)


if __name__ == "__main__":
    # Shapes matching GCN_risk's attack/fortify EdgeNet:
    #   EdgeNet(node_dim=hidden_attack_dim=32, hidden=28, num_layers=3, out=1)
    node_dim, hidden_dim, num_layers, out_dim = 32, 28, 3, 1
    n_edges = 300

    key = jax.random.PRNGKey(0)
    kp, k1, k2 = jax.random.split(key, 3)
    params = init_params(kp, node_dim, hidden_dim, num_layers, out_dim)
    v1 = jax.random.normal(k1, (n_edges, node_dim), jnp.float32)
    v2 = jax.random.normal(k2, (n_edges, node_dim), jnp.float32)

    ref = jax.block_until_ready(reference_forward(v1, v2, params))

    # (a) small-N fast path: single fused, fully VMEM-resident launch
    fwd_fast = jax.jit(edgenet_forward)
    out_fast = jax.block_until_ready(fwd_fast(v1, v2, params))
    assert out_fast.shape == (n_edges, out_dim), out_fast.shape
    err_fast = float(jnp.max(jnp.abs(out_fast - ref)))
    assert jnp.allclose(out_fast, ref, atol=1e-4, rtol=1e-4), err_fast

    # (b) streamed multi-pass path, forced with a small tile so that multiple
    #     grid steps, the accumulator init and the padded-tail masking are hit
    fwd_stream = jax.jit(functools.partial(
        edgenet_forward, block_rows=128, force_multipass=True))
    out_stream = jax.block_until_ready(fwd_stream(v1, v2, params))
    assert out_stream.shape == (n_edges, out_dim), out_stream.shape
    err_stream = float(jnp.max(jnp.abs(out_stream - ref)))
    assert jnp.allclose(out_stream, ref, atol=1e-4, rtol=1e-4), err_stream

    print("KERNEL_OK")
</pallas_src>

<mosaic_0001>
module attributes {stable_mosaic.version = 11 : i64} {
  func.func @_fused_kernel(%arg0: i32, %arg1: memref<304x64xf32, #tpu.memory_space<vmem>>, %arg2: memref<64x28xf32, #tpu.memory_space<vmem>>, %arg3: memref<1x28xf32, #tpu.memory_space<vmem>>, %arg4: memref<1x28xf32, #tpu.memory_space<vmem>>, %arg5: memref<1x28xf32, #tpu.memory_space<vmem>>, %arg6: memref<28x28xf32, #tpu.memory_space<vmem>>, %arg7: memref<1x28xf32, #tpu.memory_space<vmem>>, %arg8: memref<1x28xf32, #tpu.memory_space<vmem>>, %arg9: memref<1x28xf32, #tpu.memory_space<vmem>>, %arg10: memref<1x28xf32, #tpu.memory_space<vmem>>, %arg11: memref<1x1xf32, #tpu.memory_space<vmem>>, %arg12: memref<1x304xf32, #tpu.memory_space<vmem>>) attributes {dimension_semantics = [#tpu.dimension_semantics<arbitrary>], iteration_bounds = array<i64: 1>, scalar_prefetch = 0 : i64, scratch_operands = 0 : i64, tpu.core_type = #tpu.core_type<tc>, window_params = [{pipeline_mode = #tpu.pipeline_mode<synchronous>, transform_indices = @transform_0, window_bounds = array<i64: 304, 64>}, {pipeline_mode = #tpu.pipeline_mode<synchronous>, transform_indices = @transform_1, window_bounds = array<i64: 64, 28>}, {pipeline_mode = #tpu.pipeline_mode<synchronous>, transform_indices = @transform_2, window_bounds = array<i64: 1, 28>}, {pipeline_mode = #tpu.pipeline_mode<synchronous>, transform_indices = @transform_3, window_bounds = array<i64: 1, 28>}, {pipeline_mode = #tpu.pipeline_mode<synchronous>, transform_indices = @transform_4, window_bounds = array<i64: 1, 28>}, {pipeline_mode = #tpu.pipeline_mode<synchronous>, transform_indices = @transform_5, window_bounds = array<i64: 28, 28>}, {pipeline_mode = #tpu.pipeline_mode<synchronous>, transform_indices = @transform_6, window_bounds = array<i64: 1, 28>}, {pipeline_mode = #tpu.pipeline_mode<synchronous>, transform_indices = @transform_7, window_bounds = array<i64: 1, 28>}, {pipeline_mode = #tpu.pipeline_mode<synchronous>, transform_indices = @transform_8, window_bounds = array<i64: 1, 28>}, {pipeline_mode = #tpu.pipeline_mode<synchronous>, transform_indices = @transform_9, window_bounds = array<i64: 1, 28>}, {pipeline_mode = #tpu.pipeline_mode<synchronous>, transform_indices = @transform_10, window_bounds = array<i64: 1, 1>}, {pipeline_mode = #tpu.pipeline_mode<synchronous>, transform_indices = @transform_11, window_bounds = array<i64: 1, 304>}]} {
    %0 = tpu.iota {dimensions = array<i32: 0>} : vector<304x1xi32>
    %c300_i32 = arith.constant 300 : i32
    %1 = vector.broadcast %c300_i32 : i32 to vector<304x1xi32>
    %2 = arith.cmpi slt, %0, %1 : vector<304x1xi32>
    %c0 = arith.constant 0 : index
    %c0_0 = arith.constant 0 : index
    %3 = vector.load %arg1[%c0, %c0_0] : memref<304x64xf32, #tpu.memory_space<vmem>>, vector<304x64xf32>
    %c0_1 = arith.constant 0 : index
    %c0_2 = arith.constant 0 : index
    %4 = vector.load %arg2[%c0_1, %c0_2] : memref<64x28xf32, #tpu.memory_space<vmem>>, vector<64x28xf32>
    %cst = arith.constant dense<0.000000e+00> : vector<304x28xf32>
    %5 = tpu.matmul %3, %4, %cst {dimension_numbers = #tpu.dot_dimension_numbers<[1], [0], [0], [1], [0, 0, 1, 1], [], []>} : vector<304x64xf32>, vector<64x28xf32>, vector<304x28xf32> -> vector<304x28xf32>
    %c0_3 = arith.constant 0 : index
    %c0_4 = arith.constant 0 : index
    %6 = vector.load %arg3[%c0_3, %c0_4] : memref<1x28xf32, #tpu.memory_space<vmem>>, vector<1x28xf32>
    %7 = vector.broadcast %6 : vector<1x28xf32> to vector<304x28xf32>
    %8 = arith.addf %5, %7 : vector<304x28xf32>
    %cst_5 = arith.constant 0.000000e+00 : f32
    %9 = vector.broadcast %cst_5 : f32 to vector<304x28xf32>
    %10 = arith.maximumf %8, %9 : vector<304x28xf32>
    %c0_6 = arith.constant 0 : index
    %c0_7 = arith.constant 0 : index
    %11 = vector.load %arg4[%c0_6, %c0_7] : memref<1x28xf32, #tpu.memory_space<vmem>>, vector<1x28xf32>
    %c0_8 = arith.constant 0 : index
    %c0_9 = arith.constant 0 : index
    %12 = vector.load %arg5[%c0_8, %c0_9] : memref<1x28xf32, #tpu.memory_space<vmem>>, vector<1x28xf32>
    %cst_10 = arith.constant 0.000000e+00 : f32
    %13 = vector.shape_cast %2 : vector<304x1xi1> to vector<304x1xi1>
    %14 = vector.broadcast %13 : vector<304x1xi1> to vector<304x28xi1>
    %15 = vector.broadcast %cst_10 : f32 to vector<304x28xf32>
    %16 = arith.select %14, %10, %15 : vector<304x28xi1>, vector<304x28xf32>
    %cst_11 = arith.constant dense<0.000000e+00> : vector<28xf32>
    %17 = vector.multi_reduction <add>, %16, %cst_11 [0] : vector<304x28xf32> to vector<28xf32>
    %18 = vector.shape_cast %17 : vector<28xf32> to vector<1x28xf32>
    %cst_12 = arith.constant 0.00333333341 : f32
    %19 = vector.broadcast %cst_12 : f32 to vector<1x28xf32>
    %20 = arith.mulf %18, %19 : vector<1x28xf32>
    %21 = vector.broadcast %20 : vector<1x28xf32> to vector<304x28xf32>
    %22 = arith.subf %10, %21 : vector<304x28xf32>
    %cst_13 = arith.constant 0.000000e+00 : f32
    %23 = vector.shape_cast %2 : vector<304x1xi1> to vector<304x1xi1>
    %24 = vector.broadcast %23 : vector<304x1xi1> to vector<304x28xi1>
    %25 = vector.broadcast %cst_13 : f32 to vector<304x28xf32>
    %26 = arith.select %24, %22, %25 : vector<304x28xi1>, vector<304x28xf32>
    %27 = arith.mulf %26, %26 : vector<304x28xf32>
    %cst_14 = arith.constant dense<0.000000e+00> : vector<28xf32>
    %28 = vector.multi_reduction <add>, %27, %cst_14 [0] : vector<304x28xf32> to vector<28xf32>
    %29 = vector.shape_cast %28 : vector<28xf32> to vector<1x28xf32>
    %cst_15 = arith.constant 0.00333333341 : f32
    %30 = vector.broadcast %cst_15 : f32 to vector<1x28xf32>
    %31 = arith.mulf %29, %30 : vector<1x28xf32>
    %32 = vector.broadcast %20 : vector<1x28xf32> to vector<304x28xf32>
    %33 = arith.subf %10, %32 : vector<304x28xf32>
    %34 = vector.broadcast %11 : vector<1x28xf32> to vector<304x28xf32>
    %35 = arith.mulf %34, %33 : vector<304x28xf32>
    %cst_16 = arith.constant 9.99999974E-6 : f32
    %36 = vector.broadcast %cst_16 : f32 to vector<1x28xf32>
    %37 = arith.addf %31, %36 : vector<1x28xf32>
    %38 = math.rsqrt %37 : vector<1x28xf32>
    %39 = vector.broadcast %38 : vector<1x28xf32> to vector<304x28xf32>
    %40 = arith.mulf %35, %39 : vector<304x28xf32>
    %41 = vector.broadcast %12 : vector<1x28xf32> to vector<304x28xf32>
    %42 = arith.addf %40, %41 : vector<304x28xf32>
    %c0_17 = arith.constant 0 : index
    %c0_18 = arith.constant 0 : index
    %43 = vector.load %arg6[%c0_17, %c0_18] : memref<28x28xf32, #tpu.memory_space<vmem>>, vector<28x28xf32>
    %cst_19 = arith.constant dense<0.000000e+00> : vector<304x28xf32>
    %44 = tpu.matmul %42, %43, %cst_19 {dimension_numbers = #tpu.dot_dimension_numbers<[1], [0], [0], [1], [0, 0, 1, 1], [], []>} : vector<304x28xf32>, vector<28x28xf32>, vector<304x28xf32> -> vector<304x28xf32>
    %c0_20 = arith.constant 0 : index
    %c0_21 = arith.constant 0 : index
    %45 = vector.load %arg7[%c0_20, %c0_21] : memref<1x28xf32, #tpu.memory_space<vmem>>, vector<1x28xf32>
    %46 = vector.broadcast %45 : vector<1x28xf32> to vector<304x28xf32>
    %47 = arith.addf %44, %46 : vector<304x28xf32>
    %cst_22 = arith.constant 0.000000e+00 : f32
    %48 = vector.broadcast %cst_22 : f32 to vector<304x28xf32>
    %49 = arith.maximumf %47, %48 : vector<304x28xf32>
    %c0_23 = arith.constant 0 : index
    %c0_24 = arith.constant 0 : index
    %50 = vector.load %arg8[%c0_23, %c0_24] : memref<1x28xf32, #tpu.memory_space<vmem>>, vector<1x28xf32>
    %c0_25 = arith.constant 0 : index
    %c0_26 = arith.constant 0 : index
    %51 = vector.load %arg9[%c0_25, %c0_26] : memref<1x28xf32, #tpu.memory_space<vmem>>, vector<1x28xf32>
    %cst_27 = arith.constant 0.000000e+00 : f32
    %52 = vector.shape_cast %2 : vector<304x1xi1> to vector<304x1xi1>
    %53 = vector.broadcast %52 : vector<304x1xi1> to vector<304x28xi1>
    %54 = vector.broadcast %cst_27 : f32 to vector<304x28xf32>
    %55 = arith.select %53, %49, %54 : vector<304x28xi1>, vector<304x28xf32>
    %cst_28 = arith.constant dense<0.000000e+00> : vector<28xf32>
    %56 = vector.multi_reduction <add>, %55, %cst_28 [0] : vector<304x28xf32> to vector<28xf32>
    %57 = vector.shape_cast %56 : vector<28xf32> to vector<1x28xf32>
    %cst_29 = arith.constant 0.00333333341 : f32
    %58 = vector.broadcast %cst_29 : f32 to vector<1x28xf32>
    %59 = arith.mulf %57, %58 : vector<1x28xf32>
    %60 = vector.broadcast %59 : vector<1x28xf32> to vector<304x28xf32>
    %61 = arith.subf %49, %60 : vector<304x28xf32>
    %cst_30 = arith.constant 0.000000e+00 : f32
    %62 = vector.shape_cast %2 : vector<304x1xi1> to vector<304x1xi1>
    %63 = vector.broadcast %62 : vector<304x1xi1> to vector<304x28xi1>
    %64 = vector.broadcast %cst_30 : f32 to vector<304x28xf32>
    %65 = arith.select %63, %61, %64 : vector<304x28xi1>, vector<304x28xf32>
    %66 = arith.mulf %65, %65 : vector<304x28xf32>
    %cst_31 = arith.constant dense<0.000000e+00> : vector<28xf32>
    %67 = vector.multi_reduction <add>, %66, %cst_31 [0] : vector<304x28xf32> to vector<28xf32>
    %68 = vector.shape_cast %67 : vector<28xf32> to vector<1x28xf32>
    %cst_32 = arith.constant 0.00333333341 : f32
    %69 = vector.broadcast %cst_32 : f32 to vector<1x28xf32>
    %70 = arith.mulf %68, %69 : vector<1x28xf32>
    %71 = vector.broadcast %59 : vector<1x28xf32> to vector<304x28xf32>
    %72 = arith.subf %49, %71 : vector<304x28xf32>
    %73 = vector.broadcast %50 : vector<1x28xf32> to vector<304x28xf32>
    %74 = arith.mulf %73, %72 : vector<304x28xf32>
    %cst_33 = arith.constant 9.99999974E-6 : f32
    %75 = vector.broadcast %cst_33 : f32 to vector<1x28xf32>
    %76 = arith.addf %70, %75 : vector<1x28xf32>
    %77 = math.rsqrt %76 : vector<1x28xf32>
    %78 = vector.broadcast %77 : vector<1x28xf32> to vector<304x28xf32>
    %79 = arith.mulf %74, %78 : vector<304x28xf32>
    %80 = vector.broadcast %51 : vector<1x28xf32> to vector<304x28xf32>
    %81 = arith.addf %79, %80 : vector<304x28xf32>
    %c0_34 = arith.constant 0 : index
    %c0_35 = arith.constant 0 : index
    %82 = vector.load %arg10[%c0_34, %c0_35] : memref<1x28xf32, #tpu.memory_space<vmem>>, vector<1x28xf32>
    %cst_36 = arith.constant dense<0.000000e+00> : vector<1x304xf32>
    %83 = tpu.matmul %82, %81, %cst_36 {dimension_numbers = #tpu.dot_dimension_numbers<[1], [1], [0], [0], [0, 0, 1, 0], [], []>} : vector<1x28xf32>, vector<304x28xf32>, vector<1x304xf32> -> vector<1x304xf32>
    %c0_37 = arith.constant 0 : index
    %c0_38 = arith.constant 0 : index
    %84 = vector.load %arg11[%c0_37, %c0_38] : memref<1x1xf32, #tpu.memory_space<vmem>>, vector<1x1xf32>
    %85 = vector.broadcast %84 : vector<1x1xf32> to vector<1x304xf32>
    %86 = arith.addf %83, %85 : vector<1x304xf32>
    %cst_39 = arith.constant 0.000000e+00 : f32
    %87 = vector.broadcast %cst_39 : f32 to vector<1x304xf32>
    %88 = arith.subf %87, %86 : vector<1x304xf32>
    %89 = math.exp %88 : vector<1x304xf32>
    %cst_40 = arith.constant 1.000000e+00 : f32
    %90 = vector.broadcast %cst_40 : f32 to vector<1x304xf32>
    %91 = arith.addf %90, %89 : vector<1x304xf32>
    %cst_41 = arith.constant 1.000000e+00 : f32
    %92 = vector.broadcast %cst_41 : f32 to vector<1x304xf32>
    %93 = arith.divf %92, %91 : vector<1x304xf32>
    %c0_42 = arith.constant 0 : index
    %c0_43 = arith.constant 0 : index
    %94 = vector.load %arg12[%c0_42, %c0_43] : memref<1x304xf32, #tpu.memory_space<vmem>>, vector<1x304xf32>
    tpu.vector_store %arg12[%c0_42, %c0_43], %93 {strides = array<i32>} : memref<1x304xf32, #tpu.memory_space<vmem>>, vector<1x304xf32>,
    return
  }
  func.func @transform_0(%arg0: i32) -> (i32, i32) {
    %c0_i32 = arith.constant 0 : i32
    %c0_i32_0 = arith.constant 0 : i32
    %c0_i32_1 = arith.constant 0 : i32
    return %c0_i32, %c0_i32_0 : i32, i32
  }
  func.func @transform_1(%arg0: i32) -> (i32, i32) {
    %c0_i32 = arith.constant 0 : i32
    %c0_i32_0 = arith.constant 0 : i32
    %c0_i32_1 = arith.constant 0 : i32
    return %c0_i32, %c0_i32_0 : i32, i32
  }
  func.func @transform_2(%arg0: i32) -> (i32, i32) {
    %c0_i32 = arith.constant 0 : i32
    %c0_i32_0 = arith.constant 0 : i32
    %c0_i32_1 = arith.constant 0 : i32
    return %c0_i32, %c0_i32_0 : i32, i32
  }
  func.func @transform_3(%arg0: i32) -> (i32, i32) {
    %c0_i32 = arith.constant 0 : i32
    %c0_i32_0 = arith.constant 0 : i32
    %c0_i32_1 = arith.constant 0 : i32
    return %c0_i32, %c0_i32_0 : i32, i32
  }
  func.func @transform_4(%arg0: i32) -> (i32, i32) {
    %c0_i32 = arith.constant 0 : i32
    %c0_i32_0 = arith.constant 0 : i32
    %c0_i32_1 = arith.constant 0 : i32
    return %c0_i32, %c0_i32_0 : i32, i32
  }
  func.func @transform_5(%arg0: i32) -> (i32, i32) {
    %c0_i32 = arith.constant 0 : i32
    %c0_i32_0 = arith.constant 0 : i32
    %c0_i32_1 = arith.constant 0 : i32
    return %c0_i32, %c0_i32_0 : i32, i32
  }
  func.func @transform_6(%arg0: i32) -> (i32, i32) {
    %c0_i32 = arith.constant 0 : i32
    %c0_i32_0 = arith.constant 0 : i32
    %c0_i32_1 = arith.constant 0 : i32
    return %c0_i32, %c0_i32_0 : i32, i32
  }
  func.func @transform_7(%arg0: i32) -> (i32, i32) {
    %c0_i32 = arith.constant 0 : i32
    %c0_i32_0 = arith.constant 0 : i32
    %c0_i32_1 = arith.constant 0 : i32
    return %c0_i32, %c0_i32_0 : i32, i32
  }
  func.func @transform_8(%arg0: i32) -> (i32, i32) {
    %c0_i32 = arith.constant 0 : i32
    %c0_i32_0 = arith.constant 0 : i32
    %c0_i32_1 = arith.constant 0 : i32
    return %c0_i32, %c0_i32_0 : i32, i32
  }
  func.func @transform_9(%arg0: i32) -> (i32, i32) {
    %c0_i32 = arith.constant 0 : i32
    %c0_i32_0 = arith.constant 0 : i32
    %c0_i32_1 = arith.constant 0 : i32
    return %c0_i32, %c0_i32_0 : i32, i32
  }
  func.func @transform_10(%arg0: i32) -> (i32, i32) {
    %c0_i32 = arith.constant 0 : i32
    %c0_i32_0 = arith.constant 0 : i32
    %c0_i32_1 = arith.constant 0 : i32
    return %c0_i32, %c0_i32_0 : i32, i32
  }
  func.func @transform_11(%arg0: i32) -> (i32, i32) {
    %c0_i32 = arith.constant 0 : i32
    %c0_i32_0 = arith.constant 0 : i32
    %c0_i32_1 = arith.constant 0 : i32
    return %c0_i32, %c0_i32_0 : i32, i32
  }
}

</mosaic_0001>

<bundles_post_ra>
// kernel: edgenet_forward.1
= control target key start
LH: loop header
LB: loop body
LE: loop exit
PB: predicated region body
PF: predicated region fallthrough
CT: control target
= control target key end

     0   :  { %vm170_vm0 = vcmask 523264   ;;  %vm694_vm1 = vcmask 228352   ;;  %vm1226_vm3 = vcmask 1043456   ;;  %vm2806_vm4 = vmmov 1   ;;  %s4528_s1 = inlined_call_operand.vmem [shape: f32[64,28], index: 1, kind: input, shape index: {}]   ;;  %s4529_s0 = inlined_call_operand.vmem [shape: f32[304,64], index: 0, kind: input, shape index: {}]   ;;  %s4530_s2 = inlined_call_operand.vmem [shape: f32[1,28], index: 2, kind: input, shape index: {}]   ;;  %s4531_s3 = inlined_call_operand.vmem [shape: f32[1,28], index: 3, kind: input, shape index: {}]   ;;  %s4532_s5 = inlined_call_operand.vmem [shape: f32[28,28], index: 5, kind: input, shape index: {}]   ;;  %s4533_s4 = inlined_call_operand.vmem [shape: f32[1,28], index: 4, kind: input, shape index: {}]   ;;  %s4534_s6 = inlined_call_operand.vmem [shape: f32[1,28], index: 6, kind: input, shape index: {}]   ;;  %s4535_s9 = inlined_call_operand.vmem [shape: f32[1,28], index: 9, kind: input, shape index: {}]   ;;  %s4536_s10 = inlined_call_operand.<no memory space> [shape: f32[1,1], index: 10, kind: input, shape index: {}]   ;;  %s4537_s7 = inlined_call_operand.vmem [shape: f32[1,28], index: 7, kind: input, shape index: {}]   ;;  %s4538_s8 = inlined_call_operand.vmem [shape: f32[1,28], index: 8, kind: input, shape index: {}]   ;;  %s4539_s11 = inlined_call_operand.vmem [shape: f32[1,304], index: 11, kind: output, shape index: {}]  }
   0x1   :  { %v155_v0 = vld [vmem:[%s4528_s1] sm:$0xff]  ;;  %v156_v1 = vld [vmem:[%s4528_s1 + $0x8] sm:$0xff]  ;;  %v157_v2 = vld [vmem:[%s4528_s1 + $0x10] sm:$0xff]  ;;  %vm2808_vm6 = vmmov 0  }
   0x2   :  { %v2697_v3 = vpack.c.bf16 %v156_v1, %v155_v0  ;;  %v158_v4 = vld [vmem:[%s4528_s1 + $0x18] sm:$0xff]  ;;  %v159_v6 = vld [vmem:[%s4528_s1 + $0x20] sm:$0xff]  ;;  %v160_v7 = vld [vmem:[%s4528_s1 + $0x28] sm:$0xff] }
   0x3   :  { %v2701_v5 = vpack.c.bf16 %v158_v4, %v157_v2  ;;  %v117_v8 = vld [vmem:[%s4529_s0] sm:$0xff]  ;;  %v2705_v9 = vpack.c.bf16 %v160_v7, %v159_v6  ;;  %v161_v10 = vld [vmem:[%s4528_s1 + $0x30] sm:$0xff]  ;;  %v162_v11 = vld [vmem:[%s4528_s1 + $0x38] sm:$0xff] }
   0x4   :  { %2698 = vmatprep.subr.bf16.mxu0 %v2697_v3  ;;  %2560 = vmatprep.mubr.msk.f32.mxu0 %vm170_vm0, %v117_v8  ;;  %v2709_v12 = vpack.c.bf16 %v162_v11, %v161_v10  ;;  %v118_v13 = vld [vmem:[%s4529_s0 + $0x8] sm:$0xff]  ;;  %v119_v14 = vld [vmem:[%s4529_s0 + $0x10] sm:$0xff]  ;;  %v120_v15 = vld [vmem:[%s4529_s0 + $0x18] sm:$0xff] }
   0x5   :  { %2700 = vmatpush3.bf16.msra.mxu0 %v2697_v3  ;;  %v121_v16 = vld [vmem:[%s4529_s0 + $0x20] sm:$0xff]  ;;  %v122_v17 = vld [vmem:[%s4529_s0 + $0x28] sm:$0xff]  ;;  %v123_v18 = vld [vmem:[%s4529_s0 + $0x30] sm:$0xff] }
   0x6   :  { %2702 = vmatprep.subr.bf16.mxu0 %v2701_v5  ;;  %v124_v19 = vld [vmem:[%s4529_s0 + $0x38] sm:$0xff]  ;;  %v125_v20 = vld [vmem:[%s4529_s0 + $0x40] sm:$0xff]  ;;  %v126_v21 = vld [vmem:[%s4529_s0 + $0x48] sm:$0xff] }
   0x7   :  { %v127_v22 = vld [vmem:[%s4529_s0 + $0x50] sm:$0xff]  ;;  %v128_v23 = vld [vmem:[%s4529_s0 + $0x58] sm:$0xff]  ;;  %v129_v24 = vld [vmem:[%s4529_s0 + $0x60] sm:$0xff] }
   0x8   :  { %v130_v25 = vld [vmem:[%s4529_s0 + $0x68] sm:$0xff]  ;;  %v131_v26 = vld [vmem:[%s4529_s0 + $0x70] sm:$0xff]  ;;  %v132_v27 = vld [vmem:[%s4529_s0 + $0x78] sm:$0xff] }
   0x9   :  { %2704 = vmatpush3.bf16.msra.mxu0 %v2701_v5  ;;  %v133_v28 = vld [vmem:[%s4529_s0 + $0x80] sm:$0xff]  ;;  %v134_v29 = vld [vmem:[%s4529_s0 + $0x88] sm:$0xff]  ;;  %v135_v30 = vld [vmem:[%s4529_s0 + $0x90] sm:$0xff] }
   0xa   :  { %2706 = vmatprep.subr.bf16.mxu0 %v2705_v9  ;;  %v136_v31 = vld [vmem:[%s4529_s0 + $0x98] sm:$0xff]  ;;  %v137_v32 = vld [vmem:[%s4529_s0 + $0xa0] sm:$0xff]  ;;  %v138_v33 = vld [vmem:[%s4529_s0 + $0xa8] sm:$0xff] }
   0xb   :  { %v139_v34 = vld [vmem:[%s4529_s0 + $0xb0] sm:$0xff]  ;;  %v140_v35 = vld [vmem:[%s4529_s0 + $0xb8] sm:$0xff]  ;;  %v141_v36 = vld [vmem:[%s4529_s0 + $0xc0] sm:$0xff] }
   0xc   :  { %v142_v37 = vld [vmem:[%s4529_s0 + $0xc8] sm:$0xff]  ;;  %v143_v38 = vld [vmem:[%s4529_s0 + $0xd0] sm:$0xff]  ;;  %v144_v39 = vld [vmem:[%s4529_s0 + $0xd8] sm:$0xff] }
   0xd   :  { %2708 = vmatpush3.bf16.msra.mxu0 %v2705_v9  ;;  %v145_v40 = vld [vmem:[%s4529_s0 + $0xe0] sm:$0xff]  ;;  %v146_v41 = vld [vmem:[%s4529_s0 + $0xe8] sm:$0xff]  ;;  %v147_v42 = vld [vmem:[%s4529_s0 + $0xf0] sm:$0xff] }
   0xe   :  { %2710 = vmatprep.subr.bf16.mxu0 %v2709_v12  ;;  %v148_v43 = vld [vmem:[%s4529_s0 + $0xf8] sm:$0xff]  ;;  %v149_v44 = vld [vmem:[%s4529_s0 + $0x100] sm:$0xff]  ;;  %v150_v45 = vld [vmem:[%s4529_s0 + $0x108] sm:$0xff] }
   0xf   :  { %v151_v46 = vld [vmem:[%s4529_s0 + $0x110] sm:$0xff]  ;;  %v152_v47 = vld [vmem:[%s4529_s0 + $0x118] sm:$0xff]  ;;  %v153_v48 = vld [vmem:[%s4529_s0 + $0x120] sm:$0xff] }
  0x10   :  { %v154_v49 = vld [vmem:[%s4529_s0 + $0x128] sm:$0xff]  ;;  %v3051_v50 = vld [vmem:[%s4530_s2] ss:$0 sm:$0xff]  ;;  %vm2718_vm5 = vmpackc.low %vm1226_vm3, %vm2806_vm4 }
  0x11   :  { %2712 = vmatpush3.bf16.msra.mxu0 %v2709_v12  ;;  %vm4466_vm7 = vmpackc.low %vm694_vm1, %vm694_vm1 }
  0x14   :  { %2561 = vmatmul.mubr.msk.f32.vlgmr.msra.gmra.mrb[0].mxu0 %vm170_vm0, %v118_v13 }
  0x15   :  { %2563 = vmatprep.mubr.msk.f32.mxu0 %vm170_vm0, %v119_v14 }
  0x18   :  { %2564 = vmatmul.mubr.msk.f32.gmra.mrb[2].mxu0 %vm170_vm0, %v120_v15 }
  0x19   :  { %2566 = vmatprep.mubr.msk.f32.mxu0 %vm170_vm0, %v121_v16 }
  0x1c   :  { %2567 = vmatmul.mubr.msk.f32.gmra.mrb[4].mxu0 %vm170_vm0, %v122_v17 }
  0x1d   :  { %2569 = vmatprep.mubr.msk.f32.mxu0 %vm170_vm0, %v123_v18 }
  0x20   :  { %2570 = vmatmul.mubr.msk.f32.gmra.mrb[6].mxu0 %vm170_vm0, %v124_v19 }
  0x21   :  { %2572 = vmatprep.mubr.msk.f32.mxu0 %vm170_vm0, %v125_v20 }
  0x24   :  { %2573 = vmatmul.mubr.msk.f32.gmra.mrb[8].mxu0 %vm170_vm0, %v126_v21 }
  0x25   :  { %2575 = vmatprep.mubr.msk.f32.mxu0 %vm170_vm0, %v127_v22 }
  0x28   :  { %2576 = vmatmul.mubr.msk.f32.gmra.mrb[10].mxu0 %vm170_vm0, %v128_v23 }
  0x29   :  { %2578 = vmatprep.mubr.msk.f32.mxu0 %vm170_vm0, %v129_v24 }
  0x2c   :  { %2579 = vmatmul.mubr.msk.f32.gmra.mrb[12].mxu0 %vm170_vm0, %v130_v25 }
  0x2d   :  { %2581 = vmatprep.mubr.msk.f32.mxu0 %vm170_vm0, %v131_v26 }
  0x30   :  { %2582 = vmatmul.mubr.msk.f32.gmra.mrb[14].mxu0 %vm170_vm0, %v132_v27 }
  0x31   :  { %2584 = vmatprep.mubr.msk.f32.mxu0 %vm170_vm0, %v133_v28 }
  0x34   :  { %2585 = vmatmul.mubr.msk.f32.gmra.mrb[16].mxu0 %vm170_vm0, %v134_v29 }
  0x35   :  { %2587 = vmatprep.mubr.msk.f32.mxu0 %vm170_vm0, %v135_v30 }
  0x38   :  { %2588 = vmatmul.mubr.msk.f32.gmra.mrb[18].mxu0 %vm170_vm0, %v136_v31 }
  0x39   :  { %2590 = vmatprep.mubr.msk.f32.mxu0 %vm170_vm0, %v137_v32 }
  0x3c   :  { %2591 = vmatmul.mubr.msk.f32.gmra.mrb[20].mxu0 %vm170_vm0, %v138_v33 }
  0x3d   :  { %2593 = vmatprep.mubr.msk.f32.mxu0 %vm170_vm0, %v139_v34 }
  0x40   :  { %2594 = vmatmul.mubr.msk.f32.gmra.mrb[22].mxu0 %vm170_vm0, %v140_v35 }
  0x41   :  { %2596 = vmatprep.mubr.msk.f32.mxu0 %vm170_vm0, %v141_v36 }
  0x44   :  { %2597 = vmatmul.mubr.msk.f32.gmra.mrb[24].mxu0 %vm170_vm0, %v142_v37 }
  0x45   :  { %2599 = vmatprep.mubr.msk.f32.mxu0 %vm170_vm0, %v143_v38 }
  0x48   :  { %2600 = vmatmul.mubr.msk.f32.gmra.mrb[26].mxu0 %vm170_vm0, %v144_v39 }
  0x49   :  { %2602 = vmatprep.mubr.msk.f32.mxu0 %vm170_vm0, %v145_v40 }
  0x4c   :  { %2603 = vmatmul.mubr.msk.f32.gmra.mrb[28].mxu0 %vm170_vm0, %v146_v41 }
  0x4d   :  { %2605 = vmatprep.mubr.msk.f32.mxu0 %vm170_vm0, %v147_v42 }
  0x50   :  { %2606 = vmatmul.mubr.msk.f32.gmra.mrb[30].mxu0 %vm170_vm0, %v148_v43 }
  0x51   :  { %2608 = vmatprep.mubr.msk.f32.mxu0 %vm170_vm0, %v149_v44 }
  0x54   :  { %2609 = vmatmul.mubr.msk.f32.gmra.mrb[32].mxu0 %vm170_vm0, %v150_v45 }
  0x55   :  { %2611 = vmatprep.mubr.msk.f32.mxu0 %vm170_vm0, %v151_v46 }
  0x58   :  { %2612 = vmatmul.mubr.msk.f32.gmra.mrb[34].mxu0 %vm170_vm0, %v152_v47 }
  0x59   :  { %2614 = vmatprep.mubr.msk.f32.mxu0 %vm170_vm0, %v153_v48 }
  0x5c   :  { %2615 = vmatmul.mubr.msk.f32.gmra.mrb[36].mxu0 %vm170_vm0, %v154_v49 }
  0xe7   :  { %v2562_v51 = vpop.f32.mrb[0].mxu0 }
  0xe8   :  { %v3054_v52 = vadd.f32 %v2562_v51, %v3051_v50  ;;  %v351_v53 = vpop.f32.mrb[1].mxu0 }
  0xe9   :  { %v3057_v54 = vadd.f32 %v3051_v50, %v351_v53 }
  0xea   :  { %v4554_v55 = vmax.f32 %v3054_v52, 0.0 }
  0xeb   :  { %v4555_v56 = vmax.f32 %v3057_v54, 0.0  ;;  %v2565_v57 = vpop.f32.mrb[2].mxu0 }
  0xec   :  { %v3062_v58 = vadd.f32 %v2565_v57, %v3051_v50  ;;  %v361_v59 = vpop.f32.mrb[3].mxu0  ;;  %v696_v60 = vsel %vm694_vm1, %v4554_v55, 0.0 }
  0xed   :  { %v695_v61 = vsel %vm694_vm1, %v4555_v56, 0.0  ;;  %v3071_v62 = vadd.f32 %v3051_v50, %v361_v59 }
  0xee   :  { %v4552_v63 = vmax.f32 %v3062_v58, 0.0  ;;  %v697_v2 = vadd.f32 %v696_v60, %v695_v61 }
  0xef   :  { %v4553_v0 = vmax.f32 %v3071_v62, 0.0  ;;  %v2568_v1 = vpop.f32.mrb[4].mxu0 }
  0xf0   :  { %v3076_v3 = vadd.f32 %v2568_v1, %v3051_v50  ;;  %v371_v4 = vpop.f32.mrb[5].mxu0  ;;  %v700_v8 = vsel %vm694_vm1, %v4552_v63, 0.0 }
  0xf1   :  { %v698_v5 = vsel %vm694_vm1, %v4553_v0, 0.0  ;;  %v3082_v6 = vadd.f32 %v3051_v50, %v371_v4 }
  0xf2   :  { %v699_v7 = vadd.f32 %v698_v5, %v697_v2  ;;  %v4550_v9 = vmax.f32 %v3076_v3, 0.0 }
  0xf3   :  { %v4551_v10 = vmax.f32 %v3082_v6, 0.0  ;;  %v2571_v11 = vpop.f32.mrb[6].mxu0 }
  0xf4   :  { %v701_v12 = vadd.f32 %v700_v8, %v699_v7  ;;  %v3090_v13 = vadd.f32 %v2571_v11, %v3051_v50  ;;  %v381_v14 = vpop.f32.mrb[7].mxu0  ;;  %v704_v18 = vsel %vm694_vm1, %v4550_v9, 0.0 }
  0xf5   :  { %v702_v15 = vsel %vm694_vm1, %v4551_v10, 0.0  ;;  %v3096_v16 = vadd.f32 %v3051_v50, %v381_v14 }
  0xf6   :  { %v703_v17 = vadd.f32 %v702_v15, %v701_v12  ;;  %v4548_v19 = vmax.f32 %v3090_v13, 0.0 }
  0xf7   :  { %v4549_v20 = vmax.f32 %v3096_v16, 0.0  ;;  %v2574_v21 = vpop.f32.mrb[8].mxu0 }
  0xf8   :  { %v705_v22 = vadd.f32 %v704_v18, %v703_v17  ;;  %v3104_v23 = vadd.f32 %v2574_v21, %v3051_v50  ;;  %v391_v24 = vpop.f32.mrb[9].mxu0  ;;  %v708_v28 = vsel %vm694_vm1, %v4548_v19, 0.0 }
  0xf9   :  { %v706_v25 = vsel %vm694_vm1, %v4549_v20, 0.0  ;;  %v3110_v26 = vadd.f32 %v3051_v50, %v391_v24 }
  0xfa   :  { %v707_v27 = vadd.f32 %v706_v25, %v705_v22  ;;  %v4546_v29 = vmax.f32 %v3104_v23, 0.0 }
  0xfb   :  { %v4547_v30 = vmax.f32 %v3110_v26, 0.0  ;;  %v2577_v31 = vpop.f32.mrb[10].mxu0 }
  0xfc   :  { %v709_v32 = vadd.f32 %v708_v28, %v707_v27  ;;  %v3118_v33 = vadd.f32 %v2577_v31, %v3051_v50  ;;  %v401_v34 = vpop.f32.mrb[11].mxu0  ;;  %v712_v38 = vsel %vm694_vm1, %v4546_v29, 0.0 }
  0xfd   :  { %v710_v35 = vsel %vm694_vm1, %v4547_v30, 0.0  ;;  %v3124_v36 = vadd.f32 %v3051_v50, %v401_v34 }
  0xfe   :  { %v711_v37 = vadd.f32 %v710_v35, %v709_v32  ;;  %v4544_v39 = vmax.f32 %v3118_v33, 0.0 }
  0xff   :  { %v4545_v40 = vmax.f32 %v3124_v36, 0.0  ;;  %v2580_v41 = vpop.f32.mrb[12].mxu0 }
 0x100   :  { %v713_v42 = vadd.f32 %v712_v38, %v711_v37  ;;  %v3132_v43 = vadd.f32 %v2580_v41, %v3051_v50  ;;  %v411_v44 = vpop.f32.mrb[13].mxu0  ;;  %v716_v48 = vsel %vm694_vm1, %v4544_v39, 0.0 }
 0x101   :  { %v714_v45 = vsel %vm694_vm1, %v4545_v40, 0.0  ;;  %v3138_v46 = vadd.f32 %v3051_v50, %v411_v44 }
 0x102   :  { %v715_v47 = vadd.f32 %v714_v45, %v713_v42  ;;  %v4542_v49 = vmax.f32 %v3132_v43, 0.0 }
 0x103   :  { %v4543_v51 = vmax.f32 %v3138_v46, 0.0  ;;  %v2583_v53 = vpop.f32.mrb[14].mxu0 }
 0x104   :  { %v717_v57 = vadd.f32 %v716_v48, %v715_v47  ;;  %v3146_v59 = vadd.f32 %v2583_v53, %v3051_v50  ;;  %v421_v60 = vpop.f32.mrb[15].mxu0  ;;  %v720_v4 = vsel %vm694_vm1, %v4542_v49, 0.0 }
 0x105   :  { %v718_v61 = vsel %vm694_vm1, %v4543_v51, 0.0  ;;  %v3152_v1 = vadd.f32 %v3051_v50, %v421_v60 }
 0x106   :  { %v719_v2 = vadd.f32 %v718_v61, %v717_v57  ;;  %v4540_v5 = vmax.f32 %v3146_v59, 0.0 }
 0x107   :  { %v4541_v7 = vmax.f32 %v3152_v1, 0.0  ;;  %v2586_v8 = vpop.f32.mrb[16].mxu0 }
 0x108   :  { %v721_v11 = vadd.f32 %v720_v4, %v719_v2  ;;  %v3160_v12 = vadd.f32 %v2586_v8, %v3051_v50  ;;  %v431_v14 = vpop.f32.mrb[17].mxu0  ;;  %v724_v21 = vsel %vm694_vm1, %v4540_v5, 0.0 }
 0x109   :  { %v722_v15 = vsel %vm694_vm1, %v4541_v7, 0.0  ;;  %v3166_v17 = vadd.f32 %v3051_v50, %v431_v14 }
 0x10a   :  { %v723_v18 = vadd.f32 %v722_v15, %v721_v11  ;;  %v557_v22 = vmax.f32 %v3160_v12, 0.0 }
 0x10b   :  { %v556_v24 = vmax.f32 %v3166_v17, 0.0  ;;  %v2589_v25 = vpop.f32.mrb[18].mxu0 }
 0x10c   :  { %v725_v27 = vadd.f32 %v724_v21, %v723_v18  ;;  %v3174_v28 = vadd.f32 %v2589_v25, %v3051_v50  ;;  %v441_v31 = vpop.f32.mrb[19].mxu0  ;;  %v728_v37 = vsel %vm694_vm1, %v557_v22, 0.0 }
 0x10d   :  { %v726_v32 = vsel %vm694_vm1, %v556_v24, 0.0  ;;  %v3180_v34 = vadd.f32 %v3051_v50, %v441_v31 }
 0x10e   :  { %v727_v35 = vadd.f32 %v726_v32, %v725_v27  ;;  %v559_v38 = vmax.f32 %v3174_v28, 0.0 }
 0x10f   :  { %v558_v41 = vmax.f32 %v3180_v34, 0.0  ;;  %v2592_v42 = vpop.f32.mrb[20].mxu0 }
 0x110   :  { %v729_v44 = vadd.f32 %v728_v37, %v727_v35  ;;  %v3188_v45 = vadd.f32 %v2592_v42, %v3051_v50  ;;  %v451_v47 = vpop.f32.mrb[21].mxu0  ;;  %v732_v60 = vsel %vm694_vm1, %v559_v38, 0.0 }
 0x111   :  { %v730_v48 = vsel %vm694_vm1, %v558_v41, 0.0  ;;  %v3194_v53 = vadd.f32 %v3051_v50, %v451_v47 }
 0x112   :  { %v731_v57 = vadd.f32 %v730_v48, %v729_v44  ;;  %v561_v61 = vmax.f32 %v3188_v45, 0.0 }
 0x113   :  { %v560_v2 = vmax.f32 %v3194_v53, 0.0  ;;  %v2595_v4 = vpop.f32.mrb[22].mxu0 }
 0x114   :  { %v733_v8 = vadd.f32 %v732_v60, %v731_v57  ;;  %v3202_v11 = vadd.f32 %v2595_v4, %v3051_v50  ;;  %v461_v14 = vpop.f32.mrb[23].mxu0  ;;  %v736_v25 = vsel %vm694_vm1, %v561_v61, 0.0 }
 0x115   :  { %v734_v15 = vsel %vm694_vm1, %v560_v2, 0.0  ;;  %v3208_v18 = vadd.f32 %v3051_v50, %v461_v14 }
 0x116   :  { %v735_v21 = vadd.f32 %v734_v15, %v733_v8  ;;  %v4564_v27 = vmax.f32 %v3202_v11, 0.0  ;;  %v4591_v28 = vmax.f32 %v3202_v11, 0.0 }
 0x117   :  { %v4565_v31 = vmax.f32 %v3208_v18, 0.0  ;;  %v2598_v32 = vpop.f32.mrb[24].mxu0 }
 0x118   :  { %v737_v35 = vadd.f32 %v736_v25, %v735_v21  ;;  %v3216_v37 = vadd.f32 %v2598_v32, %v3051_v50  ;;  %v471_v42 = vpop.f32.mrb[25].mxu0  ;;  %v740_v57 = vsel %vm694_vm1, %v4564_v27, 0.0 }
 0x119   :  { %v738_v44 = vsel %vm694_vm1, %v4565_v31, 0.0  ;;  %v3222_v47 = vadd.f32 %v3051_v50, %v471_v42 }
 0x11a   :  { %v739_v48 = vadd.f32 %v738_v44, %v737_v35  ;;  %v4562_v60 = vmax.f32 %v3216_v37, 0.0  ;;  %v4593_v45 = vmax.f32 %v3216_v37, 0.0 }
 0x11b   :  { %v4563_v4 = vmax.f32 %v3222_v47, 0.0  ;;  %v2601_v8 = vpop.f32.mrb[26].mxu0 }
 0x11c   :  { %v741_v14 = vadd.f32 %v740_v57, %v739_v48  ;;  %v3230_v15 = vadd.f32 %v2601_v8, %v3051_v50  ;;  %v481_v21 = vpop.f32.mrb[27].mxu0  ;;  %v744_v42 = vsel %vm694_vm1, %v4562_v60, 0.0 }
 0x11d   :  { %v742_v25 = vsel %vm694_vm1, %v4563_v4, 0.0  ;;  %v3236_v32 = vadd.f32 %v3051_v50, %v481_v21 }
 0x11e   :  { %v743_v35 = vadd.f32 %v742_v25, %v741_v14  ;;  %v4560_v44 = vmax.f32 %v3230_v15, 0.0  ;;  %v4595_v11 = vmax.f32 %v3230_v15, 0.0 }
 0x11f   :  { %v4561_v48 = vmax.f32 %v3236_v32, 0.0  ;;  %v2604_v57 = vpop.f32.mrb[28].mxu0 }
 0x120   :  { %v745_v8 = vadd.f32 %v744_v42, %v743_v35  ;;  %v3244_v5 = vadd.f32 %v2604_v57, %v3051_v50  ;;  %v491_v7 = vpop.f32.mrb[29].mxu0  ;;  %v748_v49 = vsel %vm694_vm1, %v4560_v44, 0.0 }
 0x121   :  { %v746_v21 = vsel %vm694_vm1, %v4561_v48, 0.0  ;;  %v3250_v14 = vadd.f32 %v3051_v50, %v491_v7 }
 0x122   :  { %v747_v25 = vadd.f32 %v746_v21, %v745_v8  ;;  %v4556_v51 = vmax.f32 %v3244_v5, 0.0  ;;  %v4557_v21 = vlaneseq  ;;  %v4597_v37 = vmax.f32 %v3244_v5, 0.0 }
 0x123   :  { %v4558_v35 = vmax.f32 %v3250_v14, 0.0  ;;  %v2607_v42 = vpop.f32.mrb[30].mxu0 }
 0x124   :  { %v749_v57 = vadd.f32 %v748_v49, %v747_v25  ;;  %v3258_v39 = vadd.f32 %v2607_v42, %v3051_v50  ;;  %v501_v40 = vpop.f32.mrb[31].mxu0  ;;  %v752_v30 = vsel %vm694_vm1, %v4556_v51, 0.0  ;;  %v3275_v63 = vshrl.u32 %v4557_v21, 7 }
 0x125   :  { %v750_v7 = vsel %vm694_vm1, %v4558_v35, 0.0  ;;  %v3264_v8 = vadd.f32 %v3051_v50, %v501_v40 }
 0x126   :  { %v751_v29 = vadd.f32 %v750_v7, %v749_v57  ;;  %v4559_v19 = vmax.f32 %v3258_v39, 0.0 }
 0x127   :  { %v570_v49 = vmax.f32 %v3264_v8, 0.0  ;;  %v2610_v25 = vpop.f32.mrb[32].mxu0 }
 0x128   :  { %v753_v42 = vadd.f32 %v752_v30, %v751_v29  ;;  %v517_v20 = vadd.f32 %v2610_v25, %v3051_v50  ;;  %v511_v9 = vpop.f32.mrb[33].mxu0  ;;  %v756_v7 = vsel %vm694_vm1, %v4559_v19, 0.0 }
 0x129   :  { %v754_v10 = vsel %vm694_vm1, %v570_v49, 0.0  ;;  %v512_v40 = vadd.f32 %v3051_v50, %v511_v9  ;;  %v3284_v9 = vadd.s32 296, %v3275_v63 }
 0x12a   :  { %v755_v57 = vadd.f32 %v754_v10, %v753_v42  ;;  %v573_v0 = vmax.f32 %v517_v20, 0.0 }
 0x12b   :  { %v572_v55 = vmax.f32 %v512_v40, 0.0  ;;  %v2613_v8 = vpop.f32.mrb[34].mxu0  ;;  %vm116_vm2 = vcmp.lt.s32.totalorder %v3284_v9, 300 }
 0x12c   :  { %v757_v56 = vadd.f32 %v756_v7, %v755_v57  ;;  %v527_v29 = vadd.f32 %v2613_v8, %v3051_v50  ;;  %v521_v30 = vpop.f32.mrb[35].mxu0  ;;  %v760_v10 = vsel %vm694_vm1, %v573_v0, 0.0 }
 0x12d   :  { %v758_v25 = vsel %vm694_vm1, %v572_v55, 0.0  ;;  %v522_v51 = vadd.f32 %v3051_v50, %v521_v30 }
 0x12e   :  { %v759_v21 = vadd.f32 %v758_v25, %v757_v56  ;;  %v575_v42 = vmax.f32 %v527_v29, 0.0 }
 0x12f   :  { %v574_v35 = vmax.f32 %v522_v51, 0.0  ;;  %v2616_v19 = vpop.f32.mrb[36].mxu0 }
 0x130   :  { %v761_v20 = vadd.f32 %v760_v10, %v759_v21  ;;  %v537_v40 = vadd.f32 %v2616_v19, %v3051_v50  ;;  %v531_v57 = vpop.f32.mrb[37].mxu0  ;;  %v764_v48 = vsel %vm694_vm1, %v575_v42, 0.0 }
 0x131   :  { %v762_v7 = vsel %vm694_vm1, %v574_v35, 0.0  ;;  %v532_v8 = vadd.f32 %v3051_v50, %v531_v57 }
 0x132   :  { %v763_v30 = vadd.f32 %v762_v7, %v761_v20  ;;  %v577_v44 = vmax.f32 %v537_v40, 0.0 }
 0x133   :  { %v576_v56 = vmax.f32 %v532_v8, 0.0 }
 0x134   :  { %v693_v29 = vsel %vm116_vm2, %v577_v44, 0.0  ;;  %v765_v51 = vadd.f32 %v764_v48, %v763_v30 }
 0x135   :  { %v766_v21 = vsel %vm694_vm1, %v576_v56, 0.0  ;;  %v768_v19 = vsel %vm694_vm1, %v693_v29, 0.0 }
 0x136   :  { %v767_v25 = vadd.f32 %v766_v21, %v765_v51 }
 0x138   :  { %v769_v10 = vadd.f32 %v768_v19, %v767_v25  ;;  %v4604_v19 = vmax.f32 %v3076_v3, 0.0 }
 0x13a   :  { %v770_v60 = vrot.slane %v769_v10, 4 }
 0x13c   :  { %v771_v4 = vadd.f32 %v770_v60, %v769_v10 }
 0x13e   :  { %v772_v27 = vrot.slane %v771_v4, 2 }
 0x140   :  { %v773_v31 = vadd.f32 %v772_v27, %v771_v4 }
 0x142   :  { %v774_v50 = vrot.slane %v773_v31, 1 }
 0x144   :  { %v775_v20 = vadd.f32 %v774_v50, %v773_v31  ;;  %v4596_v31 = vmax.f32 %v3250_v14, 0.0 }
 0x146   :  { %v3296_v40 = vmul.f32 0.0033333334, %v775_v20 }
 0x148   :  { %v3301_v57 = vsub.f32 %v556_v24, %v3296_v40  ;;  %v3306_v48 = vsub.f32 %v557_v22, %v3296_v40  ;;  %v3311_v60 = vsub.f32 %v558_v41, %v3296_v40  ;;  %v3316_v27 = vsub.f32 %v559_v38, %v3296_v40 }
 0x149   :  { %v3321_v17 = vsub.f32 %v560_v2, %v3296_v40  ;;  %v3326_v12 = vsub.f32 %v561_v61, %v3296_v40  ;;  %v4590_v22 = vmax.f32 %v3208_v18, 0.0  ;;  %v3336_v34 = vsub.f32 %v4591_v28, %v3296_v40 }
 0x14a   :  { %v4592_v38 = vmax.f32 %v3222_v47, 0.0  ;;  %v3346_v53 = vsub.f32 %v4593_v45, %v3296_v40  ;;  %v4594_v61 = vmax.f32 %v3236_v32, 0.0  ;;  %v3356_v18 = vsub.f32 %v4595_v11, %v3296_v40 }
 0x14b   :  { %v3331_v24 = vsub.f32 %v4590_v22, %v3296_v40  ;;  %v3361_v47 = vsub.f32 %v4596_v31, %v3296_v40  ;;  %v3366_v4 = vsub.f32 %v4597_v37, %v3296_v40  ;;  %v3369_v7 = vsub.f32 %v570_v49, %v3296_v40 }
 0x14c   :  { %v3341_v41 = vsub.f32 %v4592_v38, %v3296_v40  ;;  %v3351_v2 = vsub.f32 %v4594_v61, %v3296_v40  ;;  %v4598_v32 = vmax.f32 %v3258_v39, 0.0  ;;  %v3377_v15 = vsub.f32 %v572_v55, %v3296_v40 }
 0x14d   :  { %v3380_v14 = vsub.f32 %v573_v0, %v3296_v40  ;;  %v3383_v30 = vsub.f32 %v574_v35, %v3296_v40  ;;  %v3386_v5 = vsub.f32 %v575_v42, %v3296_v40  ;;  %v3389_v49 = vsub.f32 %v576_v56, %v3296_v40 }
 0x14e   :  { %v3374_v8 = vsub.f32 %v4598_v32, %v3296_v40  ;;  %v3392_v29 = vsub.f32 %v577_v44, %v3296_v40  ;;  %v4599_v39 = vmax.f32 %v3057_v54, 0.0  ;;  %v4600_v0 = vmax.f32 %v3054_v52, 0.0 }
 0x14f   :  { %v4601_v35 = vmax.f32 %v3071_v62, 0.0  ;;  %v4602_v56 = vmax.f32 %v3062_v58, 0.0  ;;  %v4603_v52 = vmax.f32 %v3082_v6, 0.0  ;;  %v3428_v58 = vsub.f32 %v4604_v19, %v3296_v40 }
 0x150   :  { %v3397_v55 = vsub.f32 %v4599_v39, %v3296_v40  ;;  %v3402_v51 = vsub.f32 %v4600_v0, %v3296_v40  ;;  %v4605_v6 = vmax.f32 %v3096_v16, 0.0  ;;  %v4606_v61 = vmax.f32 %v3090_v13, 0.0  ;;  %v3461_v13 = vld [vmem:[%s4531_s3] ss:$0 sm:$0xff] }
 0x151   :  { %v3407_v42 = vsub.f32 %v4601_v35, %v3296_v40  ;;  %v3412_v44 = vsub.f32 %v4602_v56, %v3296_v40  ;;  %v3421_v25 = vsub.f32 %v4603_v52, %v3296_v40  ;;  %v858_v31 = vmul.f32 %v3428_v58, %v3428_v58 }
 0x152   :  { %v853_v54 = vmul.f32 %v3397_v55, %v3397_v55  ;;  %v854_v21 = vmul.f32 %v3402_v51, %v3402_v51  ;;  %v3437_v28 = vsub.f32 %v4605_v6, %v3296_v40  ;;  %v3445_v11 = vsub.f32 %v4606_v61, %v3296_v40 }
 0x153   :  { %v855_v62 = vmul.f32 %v3407_v42, %v3407_v42  ;;  %v856_v10 = vmul.f32 %v3412_v44, %v3412_v44  ;;  %v857_v38 = vmul.f32 %v3421_v25, %v3421_v25  ;;  %v4607_v16 = vmax.f32 %v3110_v26, 0.0 }
 0x154   :  { %v891_v50 = vsel %vm694_vm1, %v853_v54, 0.0  ;;  %v892_v20 = vsel %vm694_vm1, %v854_v21, 0.0  ;;  %v859_v0 = vmul.f32 %v3437_v28, %v3437_v28  ;;  %v4608_v54 = vmax.f32 %v3104_v23, 0.0 }
 0x155   :  { %v893_v22 = vadd.f32 %v892_v20, %v891_v50  ;;  %v894_v3 = vsel %vm694_vm1, %v855_v62, 0.0  ;;  %v896_v37 = vsel %vm694_vm1, %v856_v10, 0.0  ;;  %v3453_v39 = vsub.f32 %v4607_v16, %v3296_v40 }
 0x156   :  { %v898_v35 = vsel %vm694_vm1, %v857_v38, 0.0  ;;  %v3466_v21 = vsub.f32 %v4608_v54, %v3296_v40  ;;  %v860_v26 = vmul.f32 %v3445_v11, %v3445_v11  ;;  %v900_v52 = vsel %vm694_vm1, %v858_v31, 0.0 }
 0x157   :  { %v895_v45 = vadd.f32 %v894_v3, %v893_v22  ;;  %v4609_v19 = vmax.f32 %v3124_v36, 0.0  ;;  %v861_v50 = vmul.f32 %v3453_v39, %v3453_v39  ;;  %v902_v20 = vsel %vm694_vm1, %v859_v0, 0.0 }
 0x158   :  { %v3481_v23 = vmul.f32 %v3461_v13, %v3389_v49  ;;  %v4610_v6 = vmax.f32 %v3118_v33, 0.0  ;;  %v4611_v36 = vmax.f32 %v3138_v46, 0.0  ;;  %v904_v61 = vsel %vm694_vm1, %v860_v26, 0.0 }
 0x159   :  { %v897_v32 = vadd.f32 %v896_v37, %v895_v45  ;;  %v3474_v10 = vsub.f32 %v4609_v19, %v3296_v40  ;;  %v862_v45 = vmul.f32 %v3466_v21, %v3466_v21  ;;  %v4612_v33 = vmax.f32 %v3132_v43, 0.0  ;;  %v1101_v43 = vld [vmem:[%s4532_s5] sm:$0xff] }
 0x15a   :  { %v3486_v38 = vsub.f32 %v4610_v6, %v3296_v40  ;;  %v3491_v3 = vsub.f32 %v4611_v36, %v3296_v40  ;;  %v4613_v46 = vmax.f32 %v3152_v1, 0.0  ;;  %v4614_v1 = vmax.f32 %v3146_v59, 0.0  ;;  %v1103_v6 = vld [vmem:[%s4532_s5 + $0x10] sm:$0xff]  ;;  %v1104_v36 = vld [vmem:[%s4532_s5 + $0x18] sm:$0xf] }
 0x15b   :  { %v899_v56 = vadd.f32 %v898_v35, %v897_v32  ;;  %v863_v37 = vmul.f32 %v3474_v10, %v3474_v10  ;;  %v906_v32 = vsel %vm694_vm1, %v861_v50, 0.0  ;;  %v3502_v16 = vsub.f32 %v4612_v33, %v3296_v40 }
 0x15c   :  { %v3507_v35 = vsub.f32 %v4613_v46, %v3296_v40  ;;  %v865_v54 = vmul.f32 %v3491_v3, %v3491_v3  ;;  %v908_v26 = vsel %vm694_vm1, %v862_v45, 0.0  ;;  %v3521_v19 = vsub.f32 %v4614_v1, %v3296_v40 }
 0x15d   :  { %v901_v62 = vadd.f32 %v900_v52, %v899_v56  ;;  %v864_v56 = vmul.f32 %v3486_v38, %v3486_v38  ;;  %v866_v50 = vmul.f32 %v3502_v16, %v3502_v16  ;;  %v3552_v33 = vmul.f32 %v3461_v13, %v3392_v29 }
 0x15e   :  { %v867_v59 = vmul.f32 %v3507_v35, %v3507_v35  ;;  %v914_v45 = vsel %vm694_vm1, %v865_v54, 0.0  ;;  %v2717_v46 = vpack.c.bf16 %v1104_v36, %v1103_v6  ;;  %v868_v54 = vmul.f32 %v3521_v19, %v3521_v19 }
 0x15f   :  { %v903_v22 = vadd.f32 %v902_v20, %v901_v62  ;;  %v910_v62 = vsel %vm694_vm1, %v863_v37, 0.0  ;;  %v912_v40 = vsel %vm694_vm1, %v864_v56, 0.0  ;;  %v3544_v37 = vmul.f32 %v3461_v13, %v3383_v30 }
 0x160   :  { %v918_v1 = vsel %vm694_vm1, %v867_v59, 0.0 }
 0x161   :  { %v905_v31 = vadd.f32 %v904_v61, %v903_v22  ;;  %v1102_v22 = vld [vmem:[%s4532_s5 + $0x8] sm:$0xff]  ;;  %v3540_v61 = vmul.f32 %v3461_v13, %v3380_v14 }
 0x163   :  { %v907_v0 = vadd.f32 %v906_v32, %v905_v31  ;;  %v3548_v32 = vmul.f32 %v3461_v13, %v3386_v5 }
 0x165   :  { %v909_v52 = vadd.f32 %v908_v26, %v907_v0  ;;  %v2713_v0 = vpack.c.bf16 %v1102_v22, %v1101_v43  ;;  %v916_v26 = vsel %vm694_vm1, %v866_v50, 0.0  ;;  %v920_v22 = vsel %vm694_vm1, %v868_v54, 0.0 }
 0x166   :  { %v871_v50 = vmul.f32 %v3311_v60, %v3311_v60 }
 0x167   :  { %v911_v20 = vadd.f32 %v910_v62, %v909_v52  ;;  %2714 = vmatprep.subr.bf16.mxu1 %v2713_v0  ;;  %v869_v62 = vmul.f32 %v3301_v57, %v3301_v57 }
 0x168   :  { %2716 = vmatpush3.bf16.msra.mxu1 %v2713_v0  ;;  %v873_v0 = vmul.f32 %v3321_v17, %v3321_v17 }
 0x169   :  { %v913_v31 = vadd.f32 %v912_v40, %v911_v20  ;;  %2719 = vmatprep.subr.msk.bf16.mxu1 %vm2718_vm5, %v2717_v46  ;;  %v870_v20 = vmul.f32 %v3306_v48, %v3306_v48  ;;  %v922_v36 = vsel %vm694_vm1, %v869_v62, 0.0  ;;  %v875_v62 = vmul.f32 %v3331_v24, %v3331_v24 }
 0x16b   :  { %v915_v56 = vadd.f32 %v914_v45, %v913_v31  ;;  %v872_v45 = vmul.f32 %v3316_v27, %v3316_v27  ;;  %v924_v59 = vsel %vm694_vm1, %v870_v20, 0.0  ;;  %v876_v20 = vmul.f32 %v3336_v34, %v3336_v34 }
 0x16c   :  { %2722 = vmatpush3.bf16.msk.msra.mxu1 %vm2718_vm5, %v2717_v46  ;;  %v874_v46 = vmul.f32 %v3326_v12, %v3326_v12 }
 0x16d   :  { %v917_v52 = vadd.f32 %v916_v26, %v915_v56  ;;  %v926_v56 = vsel %vm694_vm1, %v871_v50, 0.0  ;;  %v928_v26 = vsel %vm694_vm1, %v872_v45, 0.0  ;;  %v877_v50 = vmul.f32 %v3341_v41, %v3341_v41 }
 0x16e   :  { %v878_v45 = vmul.f32 %v3346_v53, %v3346_v53 }
 0x16f   :  { %v919_v43 = vadd.f32 %v918_v1, %v917_v52  ;;  %v930_v1 = vsel %vm694_vm1, %v873_v0, 0.0  ;;  %v879_v0 = vmul.f32 %v3351_v2, %v3351_v2 }
 0x171   :  { %v921_v6 = vadd.f32 %v920_v22, %v919_v43  ;;  %v932_v22 = vsel %vm694_vm1, %v874_v46, 0.0  ;;  %v880_v46 = vmul.f32 %v3356_v18, %v3356_v18 }
 0x173   :  { %v923_v40 = vadd.f32 %v922_v36, %v921_v6  ;;  %v934_v36 = vsel %vm694_vm1, %v875_v62, 0.0  ;;  %v881_v62 = vmul.f32 %v3361_v47, %v3361_v47 }
 0x175   :  { %v925_v31 = vadd.f32 %v924_v59, %v923_v40  ;;  %v936_v59 = vsel %vm694_vm1, %v876_v20, 0.0  ;;  %v882_v20 = vmul.f32 %v3366_v4, %v3366_v4 }
 0x177   :  { %v927_v54 = vadd.f32 %v926_v56, %v925_v31  ;;  %v938_v56 = vsel %vm694_vm1, %v877_v50, 0.0  ;;  %v883_v50 = vmul.f32 %v3369_v7, %v3369_v7 }
 0x179   :  { %v929_v52 = vadd.f32 %v928_v26, %v927_v54  ;;  %v940_v26 = vsel %vm694_vm1, %v878_v45, 0.0  ;;  %v884_v45 = vmul.f32 %v3374_v8, %v3374_v8 }
 0x17b   :  { %v931_v43 = vadd.f32 %v930_v1, %v929_v52  ;;  %v942_v1 = vsel %vm694_vm1, %v879_v0, 0.0  ;;  %v885_v0 = vmul.f32 %v3377_v15, %v3377_v15 }
 0x17d   :  { %v933_v6 = vadd.f32 %v932_v22, %v931_v43  ;;  %v944_v22 = vsel %vm694_vm1, %v880_v46, 0.0  ;;  %v886_v46 = vmul.f32 %v3380_v14, %v3380_v14  ;;  %v889_v14 = vmul.f32 %v3389_v49, %v3389_v49 }
 0x17f   :  { %v935_v40 = vadd.f32 %v934_v36, %v933_v6  ;;  %v946_v36 = vsel %vm694_vm1, %v881_v62, 0.0  ;;  %v887_v62 = vmul.f32 %v3383_v30, %v3383_v30 }
 0x181   :  { %v937_v31 = vadd.f32 %v936_v59, %v935_v40  ;;  %v948_v59 = vsel %vm694_vm1, %v882_v20, 0.0  ;;  %v888_v20 = vmul.f32 %v3386_v5, %v3386_v5 }
 0x183   :  { %v939_v54 = vadd.f32 %v938_v56, %v937_v31  ;;  %v950_v56 = vsel %vm694_vm1, %v883_v50, 0.0 }
 0x185   :  { %v941_v52 = vadd.f32 %v940_v26, %v939_v54  ;;  %v952_v26 = vsel %vm694_vm1, %v884_v45, 0.0  ;;  %v960_v45 = vsel %vm694_vm1, %v888_v20, 0.0  ;;  %v980_v20 = vmul.f32 %v3461_v13, %v3402_v51 }
 0x186   :  { %v987_v51 = vmul.f32 %v3461_v13, %v3453_v39  ;;  %v994_v39 = vmul.f32 %v3461_v13, %v3521_v19  ;;  %v1001_v19 = vmul.f32 %v3461_v13, %v3331_v24  ;;  %v1008_v24 = vmul.f32 %v3461_v13, %v3366_v4 }
 0x187   :  { %v943_v43 = vadd.f32 %v942_v1, %v941_v52  ;;  %v954_v1 = vsel %vm694_vm1, %v885_v0, 0.0 }
 0x189   :  { %v945_v6 = vadd.f32 %v944_v22, %v943_v43  ;;  %v956_v22 = vsel %vm694_vm1, %v886_v46, 0.0 }
 0x18b   :  { %v947_v40 = vadd.f32 %v946_v36, %v945_v6  ;;  %v852_v6 = vsel %vm116_vm2, %v3392_v29, 0.0  ;;  %v958_v36 = vsel %vm694_vm1, %v887_v62, 0.0  ;;  %v3628_v62 = vmul.f32 %v3461_v13, %v3397_v55 }
 0x18c   :  { %v890_v30 = vmul.f32 %v852_v6, %v852_v6  ;;  %v982_v6 = vmul.f32 %v3461_v13, %v3412_v44  ;;  %v986_v55 = vmul.f32 %v3461_v13, %v3445_v11  ;;  %v989_v44 = vmul.f32 %v3461_v13, %v3474_v10 }
 0x18d   :  { %v949_v31 = vadd.f32 %v948_v59, %v947_v40  ;;  %v993_v11 = vmul.f32 %v3461_v13, %v3507_v35  ;;  %v996_v10 = vmul.f32 %v3461_v13, %v3306_v48  ;;  %v1000_v35 = vmul.f32 %v3461_v13, %v3326_v12 }
 0x18e   :  { %v964_v0 = vsel %vm694_vm1, %v890_v30, 0.0  ;;  %v1003_v48 = vmul.f32 %v3461_v13, %v3341_v41  ;;  %v1007_v12 = vmul.f32 %v3461_v13, %v3361_v47  ;;  %v1010_v41 = vmul.f32 %v3461_v13, %v3374_v8 }
 0x18f   :  { %v951_v54 = vadd.f32 %v950_v56, %v949_v31  ;;  %v962_v31 = vsel %vm694_vm1, %v889_v14, 0.0  ;;  %v984_v14 = vmul.f32 %v3461_v13, %v3428_v58  ;;  %v991_v58 = vmul.f32 %v3461_v13, %v3491_v3 }
 0x190   :  { %v998_v3 = vmul.f32 %v3461_v13, %v3316_v27  ;;  %v1005_v27 = vmul.f32 %v3461_v13, %v3351_v2 }
 0x191   :  { %v953_v52 = vadd.f32 %v952_v26, %v951_v54 }
 0x193   :  { %v955_v43 = vadd.f32 %v954_v1, %v953_v52 }
 0x195   :  { %v957_v50 = vadd.f32 %v956_v22, %v955_v43  ;;  %v981_v22 = vmul.f32 %v3461_v13, %v3407_v42  ;;  %v988_v42 = vmul.f32 %v3461_v13, %v3466_v21  ;;  %v995_v21 = vmul.f32 %v3461_v13, %v3301_v57 }
 0x196   :  { %v1002_v57 = vmul.f32 %v3461_v13, %v3336_v34  ;;  %v1009_v34 = vmul.f32 %v3461_v13, %v3369_v7 }
 0x197   :  { %v959_v40 = vadd.f32 %v958_v36, %v957_v50  ;;  %v983_v50 = vmul.f32 %v3461_v13, %v3421_v25  ;;  %v985_v36 = vmul.f32 %v3461_v13, %v3437_v28  ;;  %v990_v25 = vmul.f32 %v3461_v13, %v3486_v38 }
 0x198   :  { %v992_v28 = vmul.f32 %v3461_v13, %v3502_v16  ;;  %v997_v38 = vmul.f32 %v3461_v13, %v3311_v60  ;;  %v999_v16 = vmul.f32 %v3461_v13, %v3321_v17  ;;  %v1004_v60 = vmul.f32 %v3461_v13, %v3346_v53 }
 0x199   :  { %v961_v59 = vadd.f32 %v960_v45, %v959_v40  ;;  %v1006_v17 = vmul.f32 %v3461_v13, %v3356_v18  ;;  %v1011_v53 = vmul.f32 %v3461_v13, %v3377_v15 }
 0x19b   :  { %v963_v5 = vadd.f32 %v962_v31, %v961_v59 }
 0x19d   :  { %v965_v56 = vadd.f32 %v964_v0, %v963_v5 }
 0x19f   :  { %v966_v54 = vrot.slane %v965_v56, 4 }
 0x1a1   :  { %v967_v46 = vadd.f32 %v966_v54, %v965_v56 }
 0x1a3   :  { %v968_v29 = vrot.slane %v967_v46, 2 }
 0x1a5   :  { %v969_v26 = vadd.f32 %v968_v29, %v967_v46 }
 0x1a7   :  { %v970_v52 = vrot.slane %v969_v26, 1 }
 0x1a9   :  { %v971_v1 = vadd.f32 %v970_v52, %v969_v26 }
 0x1ab   :  { %v972_v49 = vmul.f32 0.0033333334, %v971_v1 }
 0x1ad   :  { %v1017_v43 = vadd.f32 1e-05, %v972_v49 }
 0x1af   :  { %2790 = vrsqrt.f32 %v1017_v43 }
 0x1b9   :  { %v2791_v40 = vpop.eup %2790 }
 0x1ba   :  { %v1055_v2 = vmul.f32 %v2791_v40, %v3481_v23  ;;  %v1020_v30 = vmul.f32 %v2791_v40, %v980_v20  ;;  %v1021_v18 = vmul.f32 %v2791_v40, %v981_v22  ;;  %v1022_v45 = vmul.f32 %v2791_v40, %v982_v6 }
 0x1bb   :  { %v1023_v59 = vmul.f32 %v2791_v40, %v983_v50  ;;  %v1024_v47 = vmul.f32 %v2791_v40, %v984_v14  ;;  %v1025_v31 = vmul.f32 %v2791_v40, %v985_v36  ;;  %v1026_v5 = vmul.f32 %v2791_v40, %v986_v55 }
 0x1bc   :  { %v1027_v0 = vmul.f32 %v2791_v40, %v987_v51  ;;  %v1028_v4 = vmul.f32 %v2791_v40, %v988_v42  ;;  %v1029_v56 = vmul.f32 %v2791_v40, %v989_v44  ;;  %v1030_v54 = vmul.f32 %v2791_v40, %v990_v25  ;;  %v3724_v42 = vld [vmem:[%s4533_s4] ss:$0 sm:$0xff] }
 0x1bd   :  { %v1031_v7 = vmul.f32 %v2791_v40, %v991_v58  ;;  %v1032_v46 = vmul.f32 %v2791_v40, %v992_v28  ;;  %v1033_v29 = vmul.f32 %v2791_v40, %v993_v11  ;;  %v1034_v8 = vmul.f32 %v2791_v40, %v994_v39 }
 0x1be   :  { %v1035_v26 = vmul.f32 %v2791_v40, %v995_v21  ;;  %v1036_v52 = vmul.f32 %v2791_v40, %v996_v10  ;;  %v1037_v15 = vmul.f32 %v2791_v40, %v997_v38  ;;  %v3695_v13 = vmul.f32 %v2791_v40, %v998_v3 }
 0x1bf   :  { %v3697_v23 = vmul.f32 %v2791_v40, %v999_v16  ;;  %v3699_v1 = vmul.f32 %v2791_v40, %v1000_v35  ;;  %v3701_v49 = vmul.f32 %v2791_v40, %v1001_v19  ;;  %v3703_v43 = vmul.f32 %v2791_v40, %v1002_v57 }
 0x1c0   :  { %v3705_v20 = vmul.f32 %v2791_v40, %v1003_v48  ;;  %v3707_v22 = vmul.f32 %v2791_v40, %v1004_v60  ;;  %v3709_v6 = vmul.f32 %v2791_v40, %v1005_v27  ;;  %v3711_v50 = vmul.f32 %v2791_v40, %v1006_v17 }
 0x1c1   :  { %v3713_v14 = vmul.f32 %v2791_v40, %v1007_v12  ;;  %v3715_v36 = vmul.f32 %v2791_v40, %v1008_v24  ;;  %v3717_v55 = vmul.f32 %v2791_v40, %v1009_v34  ;;  %v3719_v51 = vmul.f32 %v2791_v40, %v1010_v41 }
 0x1c2   :  { %v3726_v44 = vmul.f32 %v2791_v40, %v1011_v53  ;;  %v1052_v25 = vmul.f32 %v2791_v40, %v3540_v61  ;;  %v1053_v58 = vmul.f32 %v2791_v40, %v3544_v37  ;;  %v1054_v28 = vmul.f32 %v2791_v40, %v3548_v32 }
 0x1c3   :  { %v1056_v11 = vmul.f32 %v2791_v40, %v3552_v33  ;;  %v1019_v39 = vmul.f32 %v2791_v40, %v3628_v62  ;;  %v1064_v21 = vadd.f32 %v3724_v42, %v1020_v30  ;;  %v1065_v38 = vadd.f32 %v3724_v42, %v1021_v18 }
 0x1c4   :  { %v1066_v61 = vadd.f32 %v3724_v42, %v1022_v45  ;;  %v1067_v37 = vadd.f32 %v3724_v42, %v1023_v59  ;;  %v3742_v32 = vadd.f32 %v3724_v42, %v1052_v25  ;;  %v1097_v33 = vadd.f32 %v3724_v42, %v1053_v58 }
 0x1c5   :  { %v1063_v10 = vadd.f32 %v3724_v42, %v1019_v39  ;;  %v1098_v62 = vadd.f32 %v3724_v42, %v1054_v28  ;;  %v1099_v3 = vadd.f32 %v3724_v42, %v1055_v2  ;;  %v1100_v16 = vadd.f32 %v3724_v42, %v1056_v11 }
 0x1c6   :  { %v1068_v35 = vadd.f32 %v3724_v42, %v1024_v47  ;;  %v1069_v19 = vadd.f32 %v3724_v42, %v1025_v31  ;;  %v1070_v57 = vadd.f32 %v3724_v42, %v1026_v5  ;;  %v1071_v48 = vadd.f32 %v3724_v42, %v1027_v0 }
 0x1c7   :  { %2625 = vmatprep.mubr.msk.f32.mxu1 %vm694_vm1, %v1063_v10  ;;  %v1072_v60 = vadd.f32 %v3724_v42, %v1028_v4  ;;  %v1073_v27 = vadd.f32 %v3724_v42, %v1029_v56  ;;  %v1074_v17 = vadd.f32 %v3724_v42, %v1030_v54  ;;  %v1075_v12 = vadd.f32 %v3724_v42, %v1031_v7 }
 0x1c8   :  { %2626 = vmatmul.mubr.msk.f32.vlgmr.msra.gmra.mrb[0].mxu1 %vm694_vm1, %v1064_v21  ;;  %v1076_v40 = vadd.f32 %v3724_v42, %v1032_v46  ;;  %v1077_v24 = vadd.f32 %v3724_v42, %v1033_v29  ;;  %v1078_v34 = vadd.f32 %v3724_v42, %v1034_v8  ;;  %v1079_v41 = vadd.f32 %v3724_v42, %v1035_v26  ;;  %v3829_v8 = vld [vmem:[%s4534_s6] ss:$0 sm:$0xff] }
 0x1c9   :  { %2628 = vmatprep.mubr.msk.f32.mxu1 %vm694_vm1, %v1065_v38  ;;  %v1080_v53 = vadd.f32 %v3724_v42, %v1036_v52  ;;  %v1081_v2 = vadd.f32 %v3724_v42, %v1037_v15  ;;  %v1082_v30 = vadd.f32 %v3724_v42, %v3695_v13  ;;  %v1083_v18 = vadd.f32 %v3724_v42, %v3697_v23 }
 0x1ca   :  { %v1084_v45 = vadd.f32 %v3724_v42, %v3699_v1  ;;  %v1085_v59 = vadd.f32 %v3724_v42, %v3701_v49  ;;  %v1086_v47 = vadd.f32 %v3724_v42, %v3703_v43  ;;  %v1087_v31 = vadd.f32 %v3724_v42, %v3705_v20 }
 0x1cb   :  { %v1088_v5 = vadd.f32 %v3724_v42, %v3707_v22  ;;  %v1089_v0 = vadd.f32 %v3724_v42, %v3709_v6  ;;  %v1090_v4 = vadd.f32 %v3724_v42, %v3711_v50  ;;  %v1091_v56 = vadd.f32 %v3724_v42, %v3713_v14 }
 0x1cc   :  { %2629 = vmatmul.mubr.msk.f32.gmra.mrb[2].mxu1 %vm694_vm1, %v1066_v61  ;;  %v1092_v54 = vadd.f32 %v3724_v42, %v3715_v36  ;;  %v1093_v7 = vadd.f32 %v3724_v42, %v3717_v55  ;;  %v1094_v46 = vadd.f32 %v3724_v42, %v3719_v51  ;;  %v1095_v29 = vadd.f32 %v3724_v42, %v3726_v44 }
 0x1cd   :  { %2631 = vmatprep.mubr.msk.f32.mxu1 %vm694_vm1, %v1067_v37 }
 0x1d0   :  { %2632 = vmatmul.mubr.msk.f32.gmra.mrb[4].mxu1 %vm694_vm1, %v1068_v35 }
 0x1d1   :  { %2634 = vmatprep.mubr.msk.f32.mxu1 %vm694_vm1, %v1069_v19 }
 0x1d4   :  { %2635 = vmatmul.mubr.msk.f32.gmra.mrb[6].mxu1 %vm694_vm1, %v1070_v57 }
 0x1d5   :  { %2637 = vmatprep.mubr.msk.f32.mxu1 %vm694_vm1, %v1071_v48 }
 0x1d8   :  { %2638 = vmatmul.mubr.msk.f32.gmra.mrb[8].mxu1 %vm694_vm1, %v1072_v60 }
 0x1d9   :  { %2640 = vmatprep.mubr.msk.f32.mxu1 %vm694_vm1, %v1073_v27 }
 0x1dc   :  { %2641 = vmatmul.mubr.msk.f32.gmra.mrb[10].mxu1 %vm694_vm1, %v1074_v17 }
 0x1dd   :  { %2643 = vmatprep.mubr.msk.f32.mxu1 %vm694_vm1, %v1075_v12 }
 0x1e0   :  { %2644 = vmatmul.mubr.msk.f32.gmra.mrb[12].mxu1 %vm694_vm1, %v1076_v40 }
 0x1e1   :  { %2646 = vmatprep.mubr.msk.f32.mxu1 %vm694_vm1, %v1077_v24 }
 0x1e4   :  { %2647 = vmatmul.mubr.msk.f32.gmra.mrb[14].mxu1 %vm694_vm1, %v1078_v34 }
 0x1e5   :  { %2649 = vmatprep.mubr.msk.f32.mxu1 %vm694_vm1, %v1079_v41 }
 0x1e8   :  { %2650 = vmatmul.mubr.msk.f32.gmra.mrb[16].mxu1 %vm694_vm1, %v1080_v53 }
 0x1e9   :  { %2652 = vmatprep.mubr.msk.f32.mxu1 %vm694_vm1, %v1081_v2 }
 0x1ec   :  { %2653 = vmatmul.mubr.msk.f32.gmra.mrb[18].mxu1 %vm694_vm1, %v1082_v30 }
 0x1ed   :  { %2655 = vmatprep.mubr.msk.f32.mxu1 %vm694_vm1, %v1083_v18 }
 0x1f0   :  { %2656 = vmatmul.mubr.msk.f32.gmra.mrb[20].mxu1 %vm694_vm1, %v1084_v45 }
 0x1f1   :  { %2658 = vmatprep.mubr.msk.f32.mxu1 %vm694_vm1, %v1085_v59 }
 0x1f4   :  { %2659 = vmatmul.mubr.msk.f32.gmra.mrb[22].mxu1 %vm694_vm1, %v1086_v47 }
 0x1f5   :  { %2661 = vmatprep.mubr.msk.f32.mxu1 %vm694_vm1, %v1087_v31 }
 0x1f8   :  { %2662 = vmatmul.mubr.msk.f32.gmra.mrb[24].mxu1 %vm694_vm1, %v1088_v5 }
 0x1f9   :  { %2664 = vmatprep.mubr.msk.f32.mxu1 %vm694_vm1, %v1089_v0 }
 0x1fc   :  { %2665 = vmatmul.mubr.msk.f32.gmra.mrb[26].mxu1 %vm694_vm1, %v1090_v4 }
 0x1fd   :  { %2667 = vmatprep.mubr.msk.f32.mxu1 %vm694_vm1, %v1091_v56 }
 0x200   :  { %2668 = vmatmul.mubr.msk.f32.gmra.mrb[28].mxu1 %vm694_vm1, %v1092_v54 }
 0x201   :  { %2670 = vmatprep.mubr.msk.f32.mxu1 %vm694_vm1, %v1093_v7 }
 0x204   :  { %2671 = vmatmul.mubr.msk.f32.gmra.mrb[30].mxu1 %vm694_vm1, %v1094_v46 }
 0x205   :  { %2673 = vmatprep.mubr.msk.f32.mxu1 %vm694_vm1, %v1095_v29 }
 0x208   :  { %2674 = vmatmul.mubr.msk.f32.gmra.mrb[32].mxu1 %vm694_vm1, %v3742_v32 }
 0x209   :  { %2676 = vmatprep.mubr.msk.f32.mxu1 %vm694_vm1, %v1097_v33 }
 0x20c   :  { %2677 = vmatmul.mubr.msk.f32.gmra.mrb[34].mxu1 %vm694_vm1, %v1098_v62 }
 0x20d   :  { %2679 = vmatprep.mubr.msk.f32.mxu1 %vm694_vm1, %v1099_v3 }
 0x210   :  { %2680 = vmatmul.mubr.msk.f32.gmra.mrb[36].mxu1 %vm694_vm1, %v1100_v16 }
 0x29b   :  { %v2627_v26 = vpop.f32.mrb[0].mxu1 }
 0x29c   :  { %v3832_v52 = vadd.f32 %v2627_v26, %v3829_v8  ;;  %v1296_v15 = vpop.f32.mrb[1].mxu1 }
 0x29d   :  { %v3835_v13 = vadd.f32 %v3829_v8, %v1296_v15 }
 0x29e   :  { %v4580_v23 = vmax.f32 %v3832_v52, 0.0 }
 0x29f   :  { %v4581_v1 = vmax.f32 %v3835_v13, 0.0  ;;  %v2630_v49 = vpop.f32.mrb[2].mxu1 }
 0x2a0   :  { %v3840_v43 = vadd.f32 %v2630_v49, %v3829_v8  ;;  %v1306_v20 = vpop.f32.mrb[3].mxu1  ;;  %v1564_v22 = vsel %vm694_vm1, %v4580_v23, 0.0 }
 0x2a1   :  { %v1563_v6 = vsel %vm694_vm1, %v4581_v1, 0.0  ;;  %v3849_v50 = vadd.f32 %v3829_v8, %v1306_v20 }
 0x2a2   :  { %v4578_v14 = vmax.f32 %v3840_v43, 0.0  ;;  %v1565_v51 = vadd.f32 %v1564_v22, %v1563_v6 }
 0x2a3   :  { %v4579_v36 = vmax.f32 %v3849_v50, 0.0  ;;  %v2633_v55 = vpop.f32.mrb[4].mxu1 }
 0x2a4   :  { %v3854_v42 = vadd.f32 %v2633_v55, %v3829_v8  ;;  %v1316_v44 = vpop.f32.mrb[5].mxu1  ;;  %v1568_v11 = vsel %vm694_vm1, %v4578_v14, 0.0 }
 0x2a5   :  { %v1566_v25 = vsel %vm694_vm1, %v4579_v36, 0.0  ;;  %v3860_v58 = vadd.f32 %v3829_v8, %v1316_v44 }
 0x2a6   :  { %v1567_v28 = vadd.f32 %v1566_v25, %v1565_v51  ;;  %v4576_v39 = vmax.f32 %v3854_v42, 0.0 }
 0x2a7   :  { %v4577_v21 = vmax.f32 %v3860_v58, 0.0  ;;  %v2636_v10 = vpop.f32.mrb[6].mxu1 }
 0x2a8   :  { %v1569_v38 = vadd.f32 %v1568_v11, %v1567_v28  ;;  %v3868_v61 = vadd.f32 %v2636_v10, %v3829_v8  ;;  %v1326_v37 = vpop.f32.mrb[7].mxu1  ;;  %v1572_v3 = vsel %vm694_vm1, %v4576_v39, 0.0 }
 0x2a9   :  { %v1570_v32 = vsel %vm694_vm1, %v4577_v21, 0.0  ;;  %v3874_v33 = vadd.f32 %v3829_v8, %v1326_v37 }
 0x2aa   :  { %v1571_v62 = vadd.f32 %v1570_v32, %v1569_v38  ;;  %v4574_v16 = vmax.f32 %v3868_v61, 0.0 }
 0x2ab   :  { %v4575_v35 = vmax.f32 %v3874_v33, 0.0  ;;  %v2639_v19 = vpop.f32.mrb[8].mxu1 }
 0x2ac   :  { %v1573_v57 = vadd.f32 %v1572_v3, %v1571_v62  ;;  %v3882_v48 = vadd.f32 %v2639_v19, %v3829_v8  ;;  %v1336_v60 = vpop.f32.mrb[9].mxu1  ;;  %v1576_v40 = vsel %vm694_vm1, %v4574_v16, 0.0 }
 0x2ad   :  { %v1574_v27 = vsel %vm694_vm1, %v4575_v35, 0.0  ;;  %v3888_v17 = vadd.f32 %v3829_v8, %v1336_v60 }
 0x2ae   :  { %v1575_v12 = vadd.f32 %v1574_v27, %v1573_v57  ;;  %v4572_v24 = vmax.f32 %v3882_v48, 0.0 }
 0x2af   :  { %v4573_v34 = vmax.f32 %v3888_v17, 0.0  ;;  %v2642_v41 = vpop.f32.mrb[10].mxu1 }
 0x2b0   :  { %v1577_v53 = vadd.f32 %v1576_v40, %v1575_v12  ;;  %v3896_v2 = vadd.f32 %v2642_v41, %v3829_v8  ;;  %v1346_v30 = vpop.f32.mrb[11].mxu1  ;;  %v1580_v47 = vsel %vm694_vm1, %v4572_v24, 0.0 }
 0x2b1   :  { %v1578_v18 = vsel %vm694_vm1, %v4573_v34, 0.0  ;;  %v3902_v45 = vadd.f32 %v3829_v8, %v1346_v30 }
 0x2b2   :  { %v1579_v59 = vadd.f32 %v1578_v18, %v1577_v53  ;;  %v4570_v31 = vmax.f32 %v3896_v2, 0.0 }
 0x2b3   :  { %v4571_v5 = vmax.f32 %v3902_v45, 0.0  ;;  %v2645_v0 = vpop.f32.mrb[12].mxu1 }
 0x2b4   :  { %v1581_v4 = vadd.f32 %v1580_v47, %v1579_v59  ;;  %v3910_v56 = vadd.f32 %v2645_v0, %v3829_v8  ;;  %v1356_v54 = vpop.f32.mrb[13].mxu1  ;;  %v1584_v26 = vsel %vm694_vm1, %v4570_v31, 0.0 }
 0x2b5   :  { %v1582_v7 = vsel %vm694_vm1, %v4571_v5, 0.0  ;;  %v3916_v46 = vadd.f32 %v3829_v8, %v1356_v54 }
 0x2b6   :  { %v1583_v29 = vadd.f32 %v1582_v7, %v1581_v4  ;;  %v4568_v15 = vmax.f32 %v3910_v56, 0.0 }
 0x2b7   :  { %v4569_v49 = vmax.f32 %v3916_v46, 0.0  ;;  %v2648_v20 = vpop.f32.mrb[14].mxu1 }
 0x2b8   :  { %v1585_v22 = vadd.f32 %v1584_v26, %v1583_v29  ;;  %v3924_v6 = vadd.f32 %v2648_v20, %v3829_v8  ;;  %v1366_v55 = vpop.f32.mrb[15].mxu1  ;;  %v1588_v28 = vsel %vm694_vm1, %v4568_v15, 0.0 }
 0x2b9   :  { %v1586_v51 = vsel %vm694_vm1, %v4569_v49, 0.0  ;;  %v3930_v44 = vadd.f32 %v3829_v8, %v1366_v55 }
 0x2ba   :  { %v1587_v25 = vadd.f32 %v1586_v51, %v1585_v22  ;;  %v4566_v11 = vmax.f32 %v3924_v6, 0.0 }
 0x2bb   :  { %v4567_v10 = vmax.f32 %v3930_v44, 0.0  ;;  %v2651_v38 = vpop.f32.mrb[16].mxu1 }
 0x2bc   :  { %v1589_v37 = vadd.f32 %v1588_v28, %v1587_v25  ;;  %v3938_v32 = vadd.f32 %v2651_v38, %v3829_v8  ;;  %v1376_v62 = vpop.f32.mrb[17].mxu1  ;;  %v1592_v60 = vsel %vm694_vm1, %v4566_v11, 0.0 }
 0x2bd   :  { %v1590_v3 = vsel %vm694_vm1, %v4567_v10, 0.0  ;;  %v3944_v19 = vadd.f32 %v3829_v8, %v1376_v62 }
 0x2be   :  { %v1591_v57 = vadd.f32 %v1590_v3, %v1589_v37  ;;  %v1502_v27 = vmax.f32 %v3938_v32, 0.0 }
 0x2bf   :  { %v1501_v12 = vmax.f32 %v3944_v19, 0.0  ;;  %v2654_v40 = vpop.f32.mrb[18].mxu1 }
 0x2c0   :  { %v1593_v41 = vadd.f32 %v1592_v60, %v1591_v57  ;;  %v3952_v53 = vadd.f32 %v2654_v40, %v3829_v8  ;;  %v1386_v30 = vpop.f32.mrb[19].mxu1  ;;  %v1596_v0 = vsel %vm694_vm1, %v1502_v27, 0.0 }
 0x2c1   :  { %v1594_v18 = vsel %vm694_vm1, %v1501_v12, 0.0  ;;  %v3958_v59 = vadd.f32 %v3829_v8, %v1386_v30 }
 0x2c2   :  { %v1595_v47 = vadd.f32 %v1594_v18, %v1593_v41  ;;  %v1504_v4 = vmax.f32 %v3952_v53, 0.0 }
 0x2c3   :  { %v1503_v54 = vmax.f32 %v3958_v59, 0.0  ;;  %v2657_v7 = vpop.f32.mrb[20].mxu1 }
 0x2c4   :  { %v1597_v29 = vadd.f32 %v1596_v0, %v1595_v47  ;;  %v3966_v26 = vadd.f32 %v2657_v7, %v3829_v8  ;;  %v1396_v20 = vpop.f32.mrb[21].mxu1  ;;  %v1600_v25 = vsel %vm694_vm1, %v1504_v4, 0.0 }
 0x2c5   :  { %v1598_v22 = vsel %vm694_vm1, %v1503_v54, 0.0  ;;  %v3972_v55 = vadd.f32 %v3829_v8, %v1396_v20 }
 0x2c6   :  { %v1599_v51 = vadd.f32 %v1598_v22, %v1597_v29  ;;  %v1506_v28 = vmax.f32 %v3966_v26, 0.0 }
 0x2c7   :  { %v1505_v38 = vmax.f32 %v3972_v55, 0.0  ;;  %v2660_v37 = vpop.f32.mrb[22].mxu1 }
 0x2c8   :  { %v1601_v62 = vadd.f32 %v1600_v25, %v1599_v51  ;;  %v3980_v3 = vadd.f32 %v2660_v37, %v3829_v8  ;;  %v1406_v57 = vpop.f32.mrb[23].mxu1  ;;  %v1604_v30 = vsel %vm694_vm1, %v1506_v28, 0.0 }
 0x2c9   :  { %v1602_v60 = vsel %vm694_vm1, %v1505_v38, 0.0  ;;  %v3986_v40 = vadd.f32 %v3829_v8, %v1406_v57 }
 0x2ca   :  { %v1603_v41 = vadd.f32 %v1602_v60, %v1601_v62  ;;  %v4588_v18 = vmax.f32 %v3980_v3, 0.0  ;;  %v4616_v53 = vmax.f32 %v3980_v3, 0.0 }
 0x2cb   :  { %v4589_v47 = vmax.f32 %v3986_v40, 0.0  ;;  %v2663_v0 = vpop.f32.mrb[24].mxu1 }
 0x2cc   :  { %v1605_v7 = vadd.f32 %v1604_v30, %v1603_v41  ;;  %v3994_v29 = vadd.f32 %v2663_v0, %v3829_v8  ;;  %v1416_v20 = vpop.f32.mrb[25].mxu1  ;;  %v1608_v37 = vsel %vm694_vm1, %v4588_v18, 0.0 }
 0x2cd   :  { %v1606_v22 = vsel %vm694_vm1, %v4589_v47, 0.0  ;;  %v4000_v51 = vadd.f32 %v3829_v8, %v1416_v20 }
 0x2ce   :  { %v1607_v25 = vadd.f32 %v1606_v22, %v1605_v7  ;;  %v4586_v62 = vmax.f32 %v3994_v29, 0.0  ;;  %v4618_v26 = vmax.f32 %v3994_v29, 0.0 }
 0x2cf   :  { %v4587_v57 = vmax.f32 %v4000_v51, 0.0  ;;  %v2666_v60 = vpop.f32.mrb[26].mxu1 }
 0x2d0   :  { %v1609_v41 = vadd.f32 %v1608_v37, %v1607_v25  ;;  %v4008_v30 = vadd.f32 %v2666_v60, %v3829_v8  ;;  %v1426_v0 = vpop.f32.mrb[27].mxu1  ;;  %v1612_v11 = vsel %vm694_vm1, %v4586_v62, 0.0 }
 0x2d1   :  { %v1610_v20 = vsel %vm694_vm1, %v4587_v57, 0.0  ;;  %v4014_v7 = vadd.f32 %v3829_v8, %v1426_v0 }
 0x2d2   :  { %v1611_v22 = vadd.f32 %v1610_v20, %v1609_v41  ;;  %v4584_v10 = vmax.f32 %v4008_v30, 0.0  ;;  %v4620_v3 = vmax.f32 %v4008_v30, 0.0 }
 0x2d3   :  { %v4585_v25 = vmax.f32 %v4014_v7, 0.0  ;;  %v2669_v37 = vpop.f32.mrb[28].mxu1 }
 0x2d4   :  { %v1613_v60 = vadd.f32 %v1612_v11, %v1611_v22  ;;  %v4022_v15 = vadd.f32 %v2669_v37, %v3829_v8  ;;  %v1436_v49 = vpop.f32.mrb[29].mxu1  ;;  %v1616_v31 = vsel %vm694_vm1, %v4584_v10, 0.0 }
 0x2d5   :  { %v1614_v0 = vsel %vm694_vm1, %v4585_v25, 0.0  ;;  %v4028_v41 = vadd.f32 %v3829_v8, %v1436_v49 }
 0x2d6   :  { %v1615_v20 = vadd.f32 %v1614_v0, %v1613_v60  ;;  %v4582_v5 = vmax.f32 %v4022_v15, 0.0  ;;  %v4622_v29 = vmax.f32 %v4022_v15, 0.0 }
 0x2d7   :  { %v4583_v11 = vmax.f32 %v4028_v41, 0.0  ;;  %v2672_v22 = vpop.f32.mrb[30].mxu1 }
 0x2d8   :  { %v1617_v37 = vadd.f32 %v1616_v31, %v1615_v20  ;;  %v4036_v24 = vadd.f32 %v2672_v22, %v3829_v8  ;;  %v1446_v34 = vpop.f32.mrb[31].mxu1  ;;  %v1620_v16 = vsel %vm694_vm1, %v4582_v5, 0.0 }
 0x2d9   :  { %v1618_v49 = vsel %vm694_vm1, %v4583_v11, 0.0  ;;  %v4042_v60 = vadd.f32 %v3829_v8, %v1446_v34 }
 0x2da   :  { %v1619_v0 = vadd.f32 %v1618_v49, %v1617_v37  ;;  %v1516_v35 = vmax.f32 %v4036_v24, 0.0 }
 0x2db   :  { %v1515_v31 = vmax.f32 %v4042_v60, 0.0  ;;  %v2675_v20 = vpop.f32.mrb[32].mxu1 }
 0x2dc   :  { %v1621_v22 = vadd.f32 %v1620_v16, %v1619_v0  ;;  %v1462_v39 = vadd.f32 %v2675_v20, %v3829_v8  ;;  %v1456_v21 = vpop.f32.mrb[33].mxu1  ;;  %v1624_v37 = vsel %vm694_vm1, %v1516_v35, 0.0 }
 0x2dd   :  { %v1622_v14 = vsel %vm694_vm1, %v1515_v31, 0.0  ;;  %v1457_v36 = vadd.f32 %v3829_v8, %v1456_v21 }
 0x2de   :  { %v1623_v34 = vadd.f32 %v1622_v14, %v1621_v22  ;;  %v1518_v49 = vmax.f32 %v1462_v39, 0.0 }
 0x2df   :  { %v1517_v23 = vmax.f32 %v1457_v36, 0.0  ;;  %v2678_v1 = vpop.f32.mrb[34].mxu1 }
 0x2e0   :  { %v1625_v5 = vadd.f32 %v1624_v37, %v1623_v34  ;;  %v1472_v24 = vadd.f32 %v2678_v1, %v3829_v8  ;;  %v1466_v11 = vpop.f32.mrb[35].mxu1  ;;  %v1628_v20 = vsel %vm694_vm1, %v1518_v49, 0.0 }
 0x2e1   :  { %v1626_v60 = vsel %vm694_vm1, %v1517_v23, 0.0  ;;  %v1467_v16 = vadd.f32 %v3829_v8, %v1466_v11 }
 0x2e2   :  { %v1627_v0 = vadd.f32 %v1626_v60, %v1625_v5  ;;  %v1520_v10 = vmax.f32 %v1472_v24, 0.0 }
 0x2e3   :  { %v1519_v25 = vmax.f32 %v1467_v16, 0.0  ;;  %v2681_v21 = vpop.f32.mrb[36].mxu1 }
 0x2e4   :  { %v1629_v14 = vadd.f32 %v1628_v20, %v1627_v0  ;;  %v1482_v22 = vadd.f32 %v2681_v21, %v3829_v8  ;;  %v1476_v39 = vpop.f32.mrb[37].mxu1  ;;  %v1632_v62 = vsel %vm694_vm1, %v1520_v10, 0.0 }
 0x2e5   :  { %v1630_v36 = vsel %vm694_vm1, %v1519_v25, 0.0  ;;  %v1477_v34 = vadd.f32 %v3829_v8, %v1476_v39 }
 0x2e6   :  { %v1631_v1 = vadd.f32 %v1630_v36, %v1629_v14  ;;  %v1522_v37 = vmax.f32 %v1482_v22, 0.0  ;;  %v2807_v22 = vmov 0.0|0.0  }
 0x2e7   :  { %v1521_v57 = vmax.f32 %v1477_v34, 0.0  ;;  %2771 = vmatprep.subr.bf16.mxu0 %v2807_v22 }
 0x2e8   :  { %v1562_v5 = vsel %vm116_vm2, %v1522_v37, 0.0  ;;  %v1633_v11 = vadd.f32 %v1632_v62, %v1631_v1 }
 0x2e9   :  { %v1634_v24 = vsel %vm694_vm1, %v1521_v57, 0.0  ;;  %v1636_v16 = vsel %vm694_vm1, %v1562_v5, 0.0 }
 0x2ea   :  { %v1635_v60 = vadd.f32 %v1634_v24, %v1633_v11 }
 0x2ec   :  { %v1637_v0 = vadd.f32 %v1636_v16, %v1635_v60 }
 0x2ee   :  { %v1638_v20 = vrot.slane %v1637_v0, 4 }
 0x2f0   :  { %v1639_v21 = vadd.f32 %v1638_v20, %v1637_v0  ;;  %v4628_v20 = vmax.f32 %v3854_v42, 0.0 }
 0x2f2   :  { %v1640_v18 = vrot.slane %v1639_v21, 2 }
 0x2f4   :  { %v1641_v47 = vadd.f32 %v1640_v18, %v1639_v21 }
 0x2f6   :  { %v1642_v8 = vrot.slane %v1641_v47, 1 }
 0x2f8   :  { %v1643_v14 = vadd.f32 %v1642_v8, %v1641_v47 }
 0x2fa   :  { %v4066_v39 = vmul.f32 0.0033333334, %v1643_v14 }
 0x2fc   :  { %v4071_v62 = vsub.f32 %v1501_v12, %v4066_v39  ;;  %v4076_v36 = vsub.f32 %v1502_v27, %v4066_v39  ;;  %v4081_v18 = vsub.f32 %v1503_v54, %v4066_v39  ;;  %v4086_v47 = vsub.f32 %v1504_v4, %v4066_v39 }
 0x2fd   :  { %v4091_v19 = vsub.f32 %v1505_v38, %v4066_v39  ;;  %v4096_v32 = vsub.f32 %v1506_v28, %v4066_v39  ;;  %v4615_v27 = vmax.f32 %v3986_v40, 0.0  ;;  %v4106_v59 = vsub.f32 %v4616_v53, %v4066_v39 }
 0x2fe   :  { %v4617_v4 = vmax.f32 %v4000_v51, 0.0  ;;  %v4116_v55 = vsub.f32 %v4618_v26, %v4066_v39  ;;  %v4619_v28 = vmax.f32 %v4014_v7, 0.0  ;;  %v4126_v40 = vsub.f32 %v4620_v3, %v4066_v39 }
 0x2ff   :  { %v4101_v12 = vsub.f32 %v4615_v27, %v4066_v39  ;;  %v4621_v51 = vmax.f32 %v4028_v41, 0.0  ;;  %v4136_v1 = vsub.f32 %v4622_v29, %v4066_v39  ;;  %v4139_v5 = vsub.f32 %v1515_v31, %v4066_v39 }
 0x300   :  { %v4111_v54 = vsub.f32 %v4617_v4, %v4066_v39  ;;  %v4121_v38 = vsub.f32 %v4619_v28, %v4066_v39  ;;  %v4142_v7 = vsub.f32 %v1516_v35, %v4066_v39  ;;  %v4145_v30 = vsub.f32 %v1517_v23, %v4066_v39 }
 0x301   :  { %v4131_v34 = vsub.f32 %v4621_v51, %v4066_v39  ;;  %v4148_v11 = vsub.f32 %v1518_v49, %v4066_v39  ;;  %v4151_v41 = vsub.f32 %v1519_v25, %v4066_v39  ;;  %v4154_v24 = vsub.f32 %v1520_v10, %v4066_v39 }
 0x302   :  { %v4157_v15 = vsub.f32 %v1521_v57, %v4066_v39  ;;  %v4160_v31 = vsub.f32 %v1522_v37, %v4066_v39  ;;  %v4623_v35 = vmax.f32 %v3835_v13, 0.0  ;;  %v4624_v49 = vmax.f32 %v3832_v52, 0.0 }
 0x303   :  { %v4625_v10 = vmax.f32 %v3849_v50, 0.0  ;;  %v4626_v57 = vmax.f32 %v3840_v43, 0.0  ;;  %v4627_v52 = vmax.f32 %v3860_v58, 0.0  ;;  %v4196_v43 = vsub.f32 %v4628_v20, %v4066_v39 }
 0x304   :  { %v4165_v23 = vsub.f32 %v4623_v35, %v4066_v39  ;;  %v4170_v60 = vsub.f32 %v4624_v49, %v4066_v39  ;;  %v4629_v58 = vmax.f32 %v3874_v33, 0.0  ;;  %v4630_v28 = vmax.f32 %v3868_v61, 0.0 }
 0x305   :  { %v4175_v25 = vsub.f32 %v4625_v10, %v4066_v39  ;;  %v4180_v37 = vsub.f32 %v4626_v57, %v4066_v39  ;;  %v4189_v0 = vsub.f32 %v4627_v52, %v4066_v39  ;;  %v1726_v51 = vmul.f32 %v4196_v43, %v4196_v43 }
 0x306   :  { %v1721_v13 = vmul.f32 %v4165_v23, %v4165_v23  ;;  %v1722_v16 = vmul.f32 %v4170_v60, %v4170_v60  ;;  %v4205_v53 = vsub.f32 %v4629_v58, %v4066_v39  ;;  %v4213_v3 = vsub.f32 %v4630_v28, %v4066_v39 }
 0x307   :  { %v1723_v50 = vmul.f32 %v4175_v25, %v4175_v25  ;;  %v1724_v21 = vmul.f32 %v4180_v37, %v4180_v37  ;;  %v1725_v4 = vmul.f32 %v4189_v0, %v4189_v0  ;;  %v4631_v33 = vmax.f32 %v3888_v17, 0.0 }
 0x308   :  { %v1759_v8 = vsel %vm694_vm1, %v1721_v13, 0.0  ;;  %v1760_v14 = vsel %vm694_vm1, %v1722_v16, 0.0  ;;  %v1727_v10 = vmul.f32 %v4205_v53, %v4205_v53  ;;  %v4632_v61 = vmax.f32 %v3882_v48, 0.0 }
 0x309   :  { %v1761_v27 = vadd.f32 %v1760_v14, %v1759_v8  ;;  %v1762_v42 = vsel %vm694_vm1, %v1723_v50, 0.0  ;;  %v1764_v29 = vsel %vm694_vm1, %v1724_v21, 0.0  ;;  %v4221_v49 = vsub.f32 %v4631_v33, %v4066_v39 }
 0x30a   :  { %v1766_v57 = vsel %vm694_vm1, %v1725_v4, 0.0  ;;  %v4229_v16 = vsub.f32 %v4632_v61, %v4066_v39  ;;  %v1728_v52 = vmul.f32 %v4213_v3, %v4213_v3  ;;  %v1768_v50 = vsel %vm694_vm1, %v1726_v51, 0.0 }
 0x30b   :  { %v1763_v26 = vadd.f32 %v1762_v42, %v1761_v27  ;;  %v4633_v17 = vmax.f32 %v3902_v45, 0.0  ;;  %v1729_v8 = vmul.f32 %v4221_v49, %v4221_v49  ;;  %v1770_v14 = vsel %vm694_vm1, %v1727_v10, 0.0 }
 0x30c   :  { %v4634_v48 = vmax.f32 %v3896_v2, 0.0  ;;  %v1730_v4 = vmul.f32 %v4229_v16, %v4229_v16  ;;  %v1772_v42 = vsel %vm694_vm1, %v1728_v52, 0.0  ;;  %v4635_v45 = vmax.f32 %v3916_v46, 0.0 }
 0x30d   :  { %v1765_v35 = vadd.f32 %v1764_v29, %v1763_v26  ;;  %v4237_v21 = vsub.f32 %v4633_v17, %v4066_v39  ;;  %v1774_v29 = vsel %vm694_vm1, %v1729_v8, 0.0  ;;  %v4636_v2 = vmax.f32 %v3910_v56, 0.0 }
 0x30e   :  { %v4245_v58 = vsub.f32 %v4634_v48, %v4066_v39  ;;  %v4253_v28 = vsub.f32 %v4635_v45, %v4066_v39  ;;  %v4637_v46 = vmax.f32 %v3930_v44, 0.0  ;;  %v4638_v56 = vmax.f32 %v3924_v6, 0.0 }
 0x30f   :  { %v1767_v13 = vadd.f32 %v1766_v57, %v1765_v35  ;;  %v1731_v51 = vmul.f32 %v4237_v21, %v4237_v21  ;;  %v4261_v33 = vsub.f32 %v4636_v2, %v4066_v39  ;;  %v1776_v57 = vsel %vm694_vm1, %v1730_v4, 0.0 }
 0x310   :  { %v1732_v10 = vmul.f32 %v4245_v58, %v4245_v58  ;;  %v4269_v61 = vsub.f32 %v4637_v46, %v4066_v39  ;;  %v1733_v52 = vmul.f32 %v4253_v28, %v4253_v28  ;;  %v4277_v17 = vsub.f32 %v4638_v56, %v4066_v39 }
 0x311   :  { %v1769_v20 = vadd.f32 %v1768_v50, %v1767_v13  ;;  %v1778_v50 = vsel %vm694_vm1, %v1731_v51, 0.0  ;;  %v1734_v8 = vmul.f32 %v4261_v33, %v4261_v33  ;;  %v1737_v39 = vmul.f32 %v4071_v62, %v4071_v62 }
 0x312   :  { %v1735_v44 = vmul.f32 %v4269_v61, %v4269_v61  ;;  %v1782_v48 = vsel %vm694_vm1, %v1733_v52, 0.0  ;;  %v1740_v46 = vmul.f32 %v4086_v47, %v4086_v47 }
 0x313   :  { %v1771_v27 = vadd.f32 %v1770_v14, %v1769_v20  ;;  %v1780_v14 = vsel %vm694_vm1, %v1732_v10, 0.0  ;;  %v1739_v10 = vmul.f32 %v4081_v18, %v4081_v18 }
 0x314   :  { %v1786_v45 = vsel %vm694_vm1, %v1735_v44, 0.0 }
 0x315   :  { %v1773_v26 = vadd.f32 %v1772_v42, %v1771_v27  ;;  %v1736_v42 = vmul.f32 %v4277_v17, %v4277_v17  ;;  %v1794_v56 = vsel %vm694_vm1, %v1739_v10, 0.0 }
 0x317   :  { %v1775_v35 = vadd.f32 %v1774_v29, %v1773_v26  ;;  %v1784_v26 = vsel %vm694_vm1, %v1734_v8, 0.0  ;;  %v1738_v29 = vmul.f32 %v4076_v36, %v4076_v36 }
 0x319   :  { %v1777_v13 = vadd.f32 %v1776_v57, %v1775_v35  ;;  %v1788_v35 = vsel %vm694_vm1, %v1736_v42, 0.0  ;;  %v1790_v57 = vsel %vm694_vm1, %v1737_v39, 0.0  ;;  %v1792_v52 = vsel %vm694_vm1, %v1738_v29, 0.0 }
 0x31b   :  { %v1779_v20 = vadd.f32 %v1778_v50, %v1777_v13 }
 0x31d   :  { %v1781_v27 = vadd.f32 %v1780_v14, %v1779_v20  ;;  %v1741_v20 = vmul.f32 %v4091_v19, %v4091_v19  ;;  %v1742_v14 = vmul.f32 %v4096_v32, %v4096_v32 }
 0x31f   :  { %v1783_v4 = vadd.f32 %v1782_v48, %v1781_v27  ;;  %v1796_v27 = vsel %vm694_vm1, %v1740_v46, 0.0  ;;  %v1743_v48 = vmul.f32 %v4101_v12, %v4101_v12 }
 0x321   :  { %v1785_v6 = vadd.f32 %v1784_v26, %v1783_v4  ;;  %v1798_v4 = vsel %vm694_vm1, %v1741_v20, 0.0  ;;  %v1744_v26 = vmul.f32 %v4106_v59, %v4106_v59 }
 0x323   :  { %v1787_v51 = vadd.f32 %v1786_v45, %v1785_v6  ;;  %v1800_v6 = vsel %vm694_vm1, %v1742_v14, 0.0  ;;  %v1745_v45 = vmul.f32 %v4111_v54, %v4111_v54 }
 0x325   :  { %v1789_v2 = vadd.f32 %v1788_v35, %v1787_v51  ;;  %v1802_v51 = vsel %vm694_vm1, %v1743_v48, 0.0  ;;  %v1746_v35 = vmul.f32 %v4116_v55, %v4116_v55 }
 0x327   :  { %v1791_v13 = vadd.f32 %v1790_v57, %v1789_v2  ;;  %v1804_v2 = vsel %vm694_vm1, %v1744_v26, 0.0  ;;  %v1747_v57 = vmul.f32 %v4121_v38, %v4121_v38 }
 0x329   :  { %v1793_v50 = vadd.f32 %v1792_v52, %v1791_v13  ;;  %v1806_v13 = vsel %vm694_vm1, %v1745_v45, 0.0  ;;  %v1748_v52 = vmul.f32 %v4126_v40, %v4126_v40 }
 0x32b   :  { %v1795_v8 = vadd.f32 %v1794_v56, %v1793_v50  ;;  %v1808_v50 = vsel %vm694_vm1, %v1746_v35, 0.0  ;;  %v1749_v56 = vmul.f32 %v4131_v34, %v4131_v34 }
 0x32d   :  { %v1797_v44 = vadd.f32 %v1796_v27, %v1795_v8  ;;  %v1810_v8 = vsel %vm694_vm1, %v1747_v57, 0.0  ;;  %v1750_v27 = vmul.f32 %v4136_v1, %v4136_v1  ;;  %v1814_v26 = vsel %vm694_vm1, %v1749_v56, 0.0 }
 0x32f   :  { %v1799_v42 = vadd.f32 %v1798_v4, %v1797_v44  ;;  %v1812_v44 = vsel %vm694_vm1, %v1748_v52, 0.0  ;;  %v4333_v4 = vld [vmem:[%s4535_s9] sm:$0x1]  ;;  %v1816_v45 = vsel %vm694_vm1, %v1750_v27, 0.0  ;;  %v16_v52 = vstv %s4536_s10 }
 0x330   :  { %2535 = vmatprep.mubr.msk.f32.mxu1 %vm694_vm1, %v4333_v4  ;;  %17 = vst [vmem:[#allocation2] sm:$0x1] %v16_v52 }
 0x331   :  { %v1801_v39 = vadd.f32 %v1800_v6, %v1799_v42  ;;  %v1751_v42 = vmul.f32 %v4139_v5, %v4139_v5 }
 0x333   :  { %v1803_v29 = vadd.f32 %v1802_v51, %v1801_v39  ;;  %v1752_v39 = vmul.f32 %v4142_v7, %v4142_v7  ;;  %v1818_v35 = vsel %vm694_vm1, %v1751_v42, 0.0  ;;  %v1757_v42 = vmul.f32 %v4157_v15, %v4157_v15 }
 0x335   :  { %v1805_v10 = vadd.f32 %v1804_v2, %v1803_v29  ;;  %v1753_v29 = vmul.f32 %v4145_v30, %v4145_v30  ;;  %v1820_v57 = vsel %vm694_vm1, %v1752_v39, 0.0 }
 0x337   :  { %v1807_v46 = vadd.f32 %v1806_v13, %v1805_v10  ;;  %v1754_v10 = vmul.f32 %v4148_v11, %v4148_v11  ;;  %v2809_v13 = vmov 0.0   ;;  %v1822_v56 = vsel %vm694_vm1, %v1753_v29, 0.0 }
 0x338   :  { %2694 = vmatprep.mubr.msk.f32.mxu0 %vm2808_vm6, %v2809_v13 }
 0x339   :  { %v1809_v20 = vadd.f32 %v1808_v50, %v1807_v46  ;;  %v2810_v46 = vmov 0   ;;  %v1824_v27 = vsel %vm694_vm1, %v1754_v10, 0.0 }
 0x33a   :  { %2789 = vset.pattern.permute.xlu0 %v2810_v46 }
 0x33b   :  { %v1811_v14 = vadd.f32 %v1810_v8, %v1809_v20  ;;  %v1755_v20 = vmul.f32 %v4151_v41, %v4151_v41 }
 0x33d   :  { %v1813_v48 = vadd.f32 %v1812_v44, %v1811_v14  ;;  %v1756_v14 = vmul.f32 %v4154_v24, %v4154_v24  ;;  %v1720_v44 = vsel %vm116_vm2, %v4160_v31, 0.0 }
 0x33e   :  { %v1758_v39 = vmul.f32 %v1720_v44, %v1720_v44 }
 0x33f   :  { %v1815_v6 = vadd.f32 %v1814_v26, %v1813_v48  ;;  %v1826_v26 = vsel %vm694_vm1, %v1755_v20, 0.0 }
 0x340   :  { %v1832_v10 = vsel %vm694_vm1, %v1758_v39, 0.0 }
 0x341   :  { %v1817_v51 = vadd.f32 %v1816_v45, %v1815_v6  ;;  %v1828_v45 = vsel %vm694_vm1, %v1756_v14, 0.0 }
 0x343   :  { %v1819_v2 = vadd.f32 %v1818_v35, %v1817_v51  ;;  %v1970_v51 = vld [vmem:[#allocation2] sm:$0x1]  ;;  %v1830_v35 = vsel %vm694_vm1, %v1757_v42, 0.0 }
 0x344   :  { %1973 = vperm.xlu0 %2789, %v1970_v51  }
 0x345   :  { %v1821_v50 = vadd.f32 %v1820_v57, %v1819_v2 }
 0x347   :  { %v1823_v8 = vadd.f32 %v1822_v56, %v1821_v50 }
 0x349   :  { %v1825_v48 = vadd.f32 %v1824_v27, %v1823_v8  ;;  %v2373_v8 = vld [vmem:[%s4537_s7] ss:$0 sm:$0xff] }
 0x34a   :  { %v1883_v27 = vmul.f32 %v2373_v8, %v4157_v15  ;;  %v1884_v44 = vmul.f32 %v2373_v8, %v4160_v31  ;;  %v1848_v42 = vmul.f32 %v2373_v8, %v4170_v60  ;;  %v1851_v39 = vmul.f32 %v2373_v8, %v4189_v0 }
 0x34b   :  { %v1827_v6 = vadd.f32 %v1826_v26, %v1825_v48  ;;  %v1847_v48 = vmul.f32 %v2373_v8, %v4165_v23  ;;  %v1849_v26 = vmul.f32 %v2373_v8, %v4175_v25  ;;  %v1853_v51 = vmul.f32 %v2373_v8, %v4205_v53 }
 0x34c   :  { %v1855_v15 = vmul.f32 %v2373_v8, %v4221_v49  ;;  %v1856_v31 = vmul.f32 %v2373_v8, %v4229_v16  ;;  %v1857_v23 = vmul.f32 %v2373_v8, %v4237_v21  ;;  %v1858_v60 = vmul.f32 %v2373_v8, %v4245_v58 }
 0x34d   :  { %v1829_v29 = vadd.f32 %v1828_v45, %v1827_v6  ;;  %v1850_v6 = vmul.f32 %v2373_v8, %v4180_v37  ;;  %v1852_v45 = vmul.f32 %v2373_v8, %v4196_v43  ;;  %v1859_v25 = vmul.f32 %v2373_v8, %v4253_v28 }
 0x34e   :  { %v1860_v37 = vmul.f32 %v2373_v8, %v4261_v33  ;;  %v1861_v0 = vmul.f32 %v2373_v8, %v4269_v61  ;;  %v1862_v43 = vmul.f32 %v2373_v8, %v4277_v17  ;;  %v1863_v53 = vmul.f32 %v2373_v8, %v4071_v62 }
 0x34f   :  { %v1831_v2 = vadd.f32 %v1830_v35, %v1829_v29  ;;  %v1854_v29 = vmul.f32 %v2373_v8, %v4213_v3  ;;  %v1864_v3 = vmul.f32 %v2373_v8, %v4076_v36  ;;  %v1865_v49 = vmul.f32 %v2373_v8, %v4081_v18 }
 0x350   :  { %v1866_v16 = vmul.f32 %v2373_v8, %v4086_v47  ;;  %v1867_v21 = vmul.f32 %v2373_v8, %v4091_v19  ;;  %v1868_v58 = vmul.f32 %v2373_v8, %v4096_v32  ;;  %v1869_v28 = vmul.f32 %v2373_v8, %v4101_v12  ;;  %v4407_v12 = vld [vmem:[%s4538_s8] ss:$0 sm:$0xff] }
 0x351   :  { %v1833_v9 = vadd.f32 %v1832_v10, %v1831_v2  ;;  %v1870_v33 = vmul.f32 %v2373_v8, %v4106_v59  ;;  %v1871_v61 = vmul.f32 %v2373_v8, %v4111_v54  ;;  %v1872_v17 = vmul.f32 %v2373_v8, %v4116_v55 }
 0x352   :  { %v1873_v62 = vmul.f32 %v2373_v8, %v4121_v38  ;;  %v1874_v36 = vmul.f32 %v2373_v8, %v4126_v40  ;;  %v1875_v18 = vmul.f32 %v2373_v8, %v4131_v34  ;;  %v1876_v47 = vmul.f32 %v2373_v8, %v4136_v1 }
 0x353   :  { %v1834_v57 = vrot.slane %v1833_v9, 4  ;;  %v1877_v19 = vmul.f32 %v2373_v8, %v4139_v5  ;;  %v1878_v32 = vmul.f32 %v2373_v8, %v4142_v7  ;;  %v1879_v59 = vmul.f32 %v2373_v8, %v4145_v30 }
 0x354   :  { %v1880_v54 = vmul.f32 %v2373_v8, %v4148_v11  ;;  %v1881_v55 = vmul.f32 %v2373_v8, %v4151_v41  ;;  %v1882_v38 = vmul.f32 %v2373_v8, %v4154_v24 }
 0x355   :  { %v1835_v13 = vadd.f32 %v1834_v57, %v1833_v9 }
 0x357   :  { %v1836_v46 = vrot.slane %v1835_v13, 2 }
 0x359   :  { %v1837_v52 = vadd.f32 %v1836_v46, %v1835_v13 }
 0x35b   :  { %v1838_v50 = vrot.slane %v1837_v52, 1 }
 0x35d   :  { %v1839_v56 = vadd.f32 %v1838_v50, %v1837_v52 }
 0x35f   :  { %v1840_v20 = vmul.f32 0.0033333334, %v1839_v56 }
 0x361   :  { %v1885_v14 = vadd.f32 1e-05, %v1840_v20 }
 0x363   :  { %2792 = vrsqrt.f32 %v1885_v14 }
 0x36d   :  { %v2793_v35 = vpop.eup %2792 }
 0x36e   :  { %v1923_v40 = vmul.f32 %v2793_v35, %v1883_v27  ;;  %v1924_v34 = vmul.f32 %v2793_v35, %v1884_v44  ;;  %v1887_v1 = vmul.f32 %v2793_v35, %v1847_v48  ;;  %v1888_v5 = vmul.f32 %v2793_v35, %v1848_v42 }
 0x36f   :  { %v1889_v2 = vmul.f32 %v2793_v35, %v1849_v26  ;;  %v1890_v7 = vmul.f32 %v2793_v35, %v1850_v6  ;;  %v1891_v10 = vmul.f32 %v2793_v35, %v1851_v39  ;;  %v1892_v9 = vmul.f32 %v2793_v35, %v1852_v45 }
 0x370   :  { %v4414_v57 = vadd.f32 %v4407_v12, %v1923_v40  ;;  %v4417_v13 = vadd.f32 %v4407_v12, %v1924_v34  ;;  %v1893_v30 = vmul.f32 %v2793_v35, %v1853_v51  ;;  %v1894_v11 = vmul.f32 %v2793_v35, %v1854_v29 }
 0x371   :  { %v1895_v46 = vmul.f32 %v2793_v35, %v1855_v15  ;;  %v1896_v41 = vmul.f32 %v2793_v35, %v1856_v31  ;;  %v1897_v52 = vmul.f32 %v2793_v35, %v1857_v23  ;;  %v1898_v24 = vmul.f32 %v2793_v35, %v1858_v60 }
 0x372   :  { %v2780_v50 = vpack.c.bf16 %v4417_v13, %v4414_v57  ;;  %v1899_v56 = vmul.f32 %v2793_v35, %v1859_v25  ;;  %v1900_v20 = vmul.f32 %v2793_v35, %v1860_v37  ;;  %v1901_v8 = vmul.f32 %v2793_v35, %v1861_v0 }
 0x373   :  { %v1902_v14 = vmul.f32 %v2793_v35, %v1862_v43  ;;  %v1903_v27 = vmul.f32 %v2793_v35, %v1863_v53  ;;  %v1904_v44 = vmul.f32 %v2793_v35, %v1864_v3  ;;  %v1905_v48 = vmul.f32 %v2793_v35, %v1865_v49 }
 0x374   :  { %v1906_v42 = vmul.f32 %v2793_v35, %v1866_v16  ;;  %v1907_v26 = vmul.f32 %v2793_v35, %v1867_v21  ;;  %v1908_v6 = vmul.f32 %v2793_v35, %v1868_v58  ;;  %v1909_v39 = vmul.f32 %v2793_v35, %v1869_v28 }
 0x375   :  { %v1910_v45 = vmul.f32 %v2793_v35, %v1870_v33  ;;  %v1911_v51 = vmul.f32 %v2793_v35, %v1871_v61  ;;  %v1912_v29 = vmul.f32 %v2793_v35, %v1872_v17  ;;  %v1913_v15 = vmul.f32 %v2793_v35, %v1873_v62 }
 0x376   :  { %v1914_v31 = vmul.f32 %v2793_v35, %v1874_v36  ;;  %v1915_v23 = vmul.f32 %v2793_v35, %v1875_v18  ;;  %v1916_v60 = vmul.f32 %v2793_v35, %v1876_v47  ;;  %v1917_v40 = vmul.f32 %v2793_v35, %v1877_v19 }
 0x377   :  { %v1918_v34 = vmul.f32 %v2793_v35, %v1878_v32  ;;  %v1919_v25 = vmul.f32 %v2793_v35, %v1879_v59  ;;  %v1920_v37 = vmul.f32 %v2793_v35, %v1880_v54  ;;  %v1921_v0 = vmul.f32 %v2793_v35, %v1881_v55 }
 0x378   :  { %v1922_v43 = vmul.f32 %v2793_v35, %v1882_v38  ;;  %v1931_v53 = vadd.f32 %v4407_v12, %v1887_v1  ;;  %v1932_v3 = vadd.f32 %v4407_v12, %v1888_v5  ;;  %v1933_v49 = vadd.f32 %v4407_v12, %v1889_v2 }
 0x379   :  { %v1934_v16 = vadd.f32 %v4407_v12, %v1890_v7  ;;  %v1935_v21 = vadd.f32 %v4407_v12, %v1891_v10  ;;  %v1936_v58 = vadd.f32 %v4407_v12, %v1892_v9  ;;  %v1937_v28 = vadd.f32 %v4407_v12, %v1893_v30 }
 0x37a   :  { %v1938_v33 = vadd.f32 %v4407_v12, %v1894_v11  ;;  %v4430_v61 = vadd.f32 %v4407_v12, %v1895_v46  ;;  %v1940_v17 = vadd.f32 %v4407_v12, %v1896_v41  ;;  %v4434_v62 = vadd.f32 %v4407_v12, %v1897_v52 }
 0x37b   :  { %v1942_v36 = vadd.f32 %v4407_v12, %v1898_v24  ;;  %v4438_v18 = vadd.f32 %v4407_v12, %v1899_v56  ;;  %v1944_v47 = vadd.f32 %v4407_v12, %v1900_v20  ;;  %v4442_v19 = vadd.f32 %v4407_v12, %v1901_v8 }
 0x37c   :  { %v1946_v32 = vadd.f32 %v4407_v12, %v1902_v14  ;;  %v1947_v35 = vadd.f32 %v4407_v12, %v1903_v27  ;;  %v1948_v59 = vadd.f32 %v4407_v12, %v1904_v44  ;;  %v1949_v54 = vadd.f32 %v4407_v12, %v1905_v48 }
 0x37d   :  { %v1950_v55 = vadd.f32 %v4407_v12, %v1906_v42  ;;  %v1951_v38 = vadd.f32 %v4407_v12, %v1907_v26  ;;  %v1952_v1 = vadd.f32 %v4407_v12, %v1908_v6  ;;  %v1953_v5 = vadd.f32 %v4407_v12, %v1909_v39 }
 0x37e   :  { %v1954_v2 = vadd.f32 %v4407_v12, %v1910_v45  ;;  %v1955_v7 = vadd.f32 %v4407_v12, %v1911_v51  ;;  %v1956_v10 = vadd.f32 %v4407_v12, %v1912_v29  ;;  %v1957_v9 = vadd.f32 %v4407_v12, %v1913_v15 }
 0x37f   :  { %v1958_v30 = vadd.f32 %v4407_v12, %v1914_v31  ;;  %v1959_v11 = vadd.f32 %v4407_v12, %v1915_v23  ;;  %v1960_v46 = vadd.f32 %v4407_v12, %v1916_v60  ;;  %v1961_v41 = vadd.f32 %v4407_v12, %v1917_v40 }
 0x380   :  { %v1962_v52 = vadd.f32 %v4407_v12, %v1918_v34  ;;  %v1963_v24 = vadd.f32 %v4407_v12, %v1919_v25  ;;  %v1964_v56 = vadd.f32 %v4407_v12, %v1920_v37  ;;  %v1965_v20 = vadd.f32 %v4407_v12, %v1921_v0 }
 0x381   :  { %v1966_v14 = vadd.f32 %v4407_v12, %v1922_v43  ;;  %v2723_v27 = vpack.c.bf16 %v1948_v59, %v1947_v35  ;;  %v2726_v44 = vpack.c.bf16 %v1932_v3, %v1931_v53  ;;  %v2732_v48 = vpack.c.bf16 %v1934_v16, %v1933_v49 }
 0x382   :  { %v2738_v42 = vpack.c.bf16 %v1936_v58, %v1935_v21  ;;  %v2744_v26 = vpack.c.bf16 %v1938_v33, %v1937_v28  ;;  %v2750_v6 = vpack.c.bf16 %v1940_v17, %v4430_v61  ;;  %v2756_v39 = vpack.c.bf16 %v1942_v36, %v4434_v62 }
 0x383   :  { %2725 = vmatprep.subr.msk.bf16.mxu1 %vm4466_vm7, %v2723_v27  ;;  %v2762_v45 = vpack.c.bf16 %v1944_v47, %v4438_v18  ;;  %v2768_v51 = vpack.c.bf16 %v1946_v32, %v4442_v19  ;;  %v2772_v29 = vpack.c.bf16 %v1964_v56, %v1963_v24  ;;  %v2776_v15 = vpack.c.bf16 %v1966_v14, %v1965_v20 }
 0x384   :  { %2728 = vmatpush3.bf16.xpose.msk.msra.mxu1 %vm4466_vm7, %v2726_v44  ;;  %v2729_v12 = vpack.c.bf16 %v1950_v55, %v1949_v54  ;;  %v2735_v31 = vpack.c.bf16 %v1952_v1, %v1951_v38  ;;  %v2741_v23 = vpack.c.bf16 %v1954_v2, %v1953_v5  ;;  %v2747_v60 = vpack.c.bf16 %v1956_v10, %v1955_v7 }
 0x385   :  { %2774 = vmatpush3.bf16.xpose.msk.msra.mxu0 %vm4466_vm7, %v2772_v29  ;;  %v2753_v40 = vpack.c.bf16 %v1958_v30, %v1957_v9  ;;  %v2759_v34 = vpack.c.bf16 %v1960_v46, %v1959_v11  ;;  %v2765_v25 = vpack.c.bf16 %v1962_v52, %v1961_v41  ;;  %v1978_v13 = vsub.s32 0, %v3275_v63 }
 0x386   :  { %2731 = vmatprep.subr.msk.bf16.mxu1 %vm4466_vm7, %v2729_v12  ;;  %2775 = vmatprep.subr.bf16.mxu0 %v2807_v22  ;;  %v2811_v19 = vmov 1966171168   ;;  %v4641_v10 = vlaneseq }
 0x387   :  { %v2261_v32 = vunpack.c.l.s4 %v2811_v19 }
 0x388   :  { %vm2285_vm8 = vcmp.lt.s32.totalorder %v4641_v10, 304 }
 0x389   :  { %v2262_v35 = vunpack.c.0.s8 %v2261_v32 }
 0x38b   :  { %v2265_v55 = vsub.s32 %v2262_v35, %v3275_v63 }
 0x38c   :  { %2734 = vmatpush3.bf16.xpose.msk.msra.mxu1 %vm4466_vm7, %v2732_v48 }
 0x38d   :  { %2778 = vmatpush3.bf16.xpose.msk.msra.mxu0 %vm4466_vm7, %v2776_v15  ;;  %2737 = vmatprep.subr.msk.bf16.mxu1 %vm4466_vm7, %v2735_v31 }
 0x38e   :  { %2779 = vmatprep.subr.bf16.mxu0 %v2807_v22 }
 0x394   :  { %2740 = vmatpush3.bf16.xpose.msk.msra.mxu1 %vm4466_vm7, %v2738_v42 }
 0x395   :  { %2782 = vmatpush3.bf16.xpose.msk.msra.mxu0 %vm4466_vm7, %v2780_v50  ;;  %2743 = vmatprep.subr.msk.bf16.mxu1 %vm4466_vm7, %v2741_v23 }
 0x39c   :  { %2746 = vmatpush3.bf16.xpose.msk.msra.mxu1 %vm4466_vm7, %v2744_v26  ;;  %2695 = vmatmul.mubr.msk.f32.vlgmr.msra.gmra.mrb[38].mxu0 %vm694_vm1, %v4333_v4 }
 0x39d   :  { %2749 = vmatprep.subr.msk.bf16.mxu1 %vm4466_vm7, %v2747_v60 }
 0x3a4   :  { %2752 = vmatpush3.bf16.xpose.msk.msra.mxu1 %vm4466_vm7, %v2750_v6 }
 0x3a5   :  { %2755 = vmatprep.subr.msk.bf16.mxu1 %vm4466_vm7, %v2753_v40 }
 0x3ac   :  { %2758 = vmatpush3.bf16.xpose.msk.msra.mxu1 %vm4466_vm7, %v2756_v39 }
 0x3ad   :  { %2761 = vmatprep.subr.msk.bf16.mxu1 %vm4466_vm7, %v2759_v34 }
 0x3b4   :  { %2764 = vmatpush3.bf16.xpose.msk.msra.mxu1 %vm4466_vm7, %v2762_v45 }
 0x3b5   :  { %2767 = vmatprep.subr.msk.bf16.mxu1 %vm4466_vm7, %v2765_v25 }
 0x3bc   :  { %2770 = vmatpush3.bf16.xpose.msk.msra.mxu1 %vm4466_vm7, %v2768_v51 }
 0x3c3   :  { %2536 = vmatmul.mubr.msk.f32.vlgmr.msra.gmra.mrb[38].mxu1 %vm694_vm1, %v4333_v4  ;;  %v1974_v50 = vpop.permute.xlu0 %1973 }
 0x3c4   :  { %v1979_v37 = vrot.slane %v1974_v50, %v1978_v13 }
 0x46f   :  { %v2234_v22 = vpop.f32.mrb[38].mxu0 }
 0x470   :  { %v2696_v57 = vpop.f32.mrb[39].mxu0  ;;  %v2235_v0 = vadd.f32 %v2234_v22, %v1979_v37 }
 0x472   :  { %v2240_v43 = vsub.f32 0.0, %v2235_v0 }
 0x474   :  { %v2245_v53 = vmul.f32 1.442695, %v2240_v43 }
 0x476   :  { %2794 = vpow2.f32 %v2245_v53 }
 0x480   :  { %v2795_v4 = vpop.eup %2794 }
 0x481   :  { %v2249_v17 = vadd.f32 1.0, %v2795_v4 }
 0x496   :  { %v2163_v3 = vpop.f32.mrb[38].mxu1 }
 0x497   :  { %v2164_v49 = vadd.f32 %v2163_v3, %v1979_v37  ;;  %v2165_v16 = vpop.f32.mrb[39].mxu1 }
 0x498   :  { %v2166_v21 = vadd.f32 %v2165_v16, %v1979_v37 }
 0x499   :  { %v2238_v58 = vsub.f32 0.0, %v2164_v49 }
 0x49a   :  { %v2239_v28 = vsub.f32 0.0, %v2166_v21 }
 0x49b   :  { %v2241_v33 = vmul.f32 1.442695, %v2238_v58 }
 0x49c   :  { %v2243_v61 = vmul.f32 1.442695, %v2239_v28 }
 0x49d   :  { %2796 = vpow2.f32 %v2241_v33 }
 0x49e   :  { %2798 = vpow2.f32 %v2243_v61 }
 0x49f   :  { %2800 = vrcp.f32 %v2249_v17 }
 0x4a7   :  { %v2797_v62 = vpop.eup %2796 }
 0x4a8   :  { %v2799_v36 = vpop.eup %2798  ;;  %v2247_v18 = vadd.f32 1.0, %v2797_v62 }
 0x4a9   :  { %v2248_v47 = vadd.f32 1.0, %v2799_v36  ;;  %v2801_v59 = vpop.eup %2800 }
 0x4aa   :  { %2802 = vrcp.f32 %v2247_v18  ;;  %v2273_v2 = vrot.slane %v2801_v59, %v2265_v55 }
 0x4ab   :  { %2804 = vrcp.f32 %v2248_v47 }
 0x4b4   :  { %v2803_v54 = vpop.eup %2802 }
 0x4b5   :  { %v2805_v38 = vpop.eup %2804 }
 0x4b6   :  { %v2259_v1 = vcombine.low %v2803_v54, %v2805_v38 }
 0x4b8   :  { %v2266_v5 = vrot.slane %v2259_v1, %v2265_v55 }
 0x4ba   :  { %v2274_v7 = vcombine.low %v2266_v5, %v2273_v2 }
 0x4bc   :  { %v2281_v9 = vrot.slane %v2274_v7, %v2265_v55 }
 0x4be   :  { %2287 = vst.msk [vmem:[%s4539_s11] sm:$0x7] %vm2285_vm8, %v2281_v9 }

</bundles_post_ra>
